<compile_context>
chip_gen: v7x
topology: tpu7x:2x2x1
jax: 0.10.0
libtpu: 0.0.40
codegen_flags: <defaults>
</compile_context>

<pallas_src>
import jax
import jax.numpy as jnp
from jax import lax
from jax.experimental import pallas as pl
from jax.experimental.pallas import tpu as pltpu

# ----------------------------- model sizes (small) -----------------------------
VOCAB = 50      # len(word2idx)
E = 32          # config.emsize
H = 32          # config.word_gru_hidden
C = 4           # config.class_number
T = 8           # sequence length
B = 16          # batch size (module supports any batch; 16 -> two parallel grid blocks)

# ----------------------------- kernel layout constants --------------------------
GP = 128        # per-gate lane pitch = one full vreg lane width
NBLK = 3        # gate blocks: [r, z, n]; inside each block fwd lanes 0:H, bwd lanes H:2H
NG = NBLK * GP  # 384 gate lanes total
BB = 8          # batch rows per kernel block (one full sublane group)
VPAD = 128      # embedding-table rows padded to a full lane pitch for the one-hot matmul
# hidden-state layout: lanes [0:H] = h_fwd, lanes [H:2H] = h_bwd, lanes [2H:GP] stay 0.


# ----------------------------- Pallas kernel -----------------------------------
def rnn_pooling_kernel(tok_ref, emb_ref, wf_ref, wb_ref, whh_ref,
                       bih_ref, bhh_ref, wfc_ref, bfc_ref,
                       logit_ref, wv_ref, p_ref, q_ref):
    # tok_ref : (T*BB, 1) int32, row index = t*BB + local_batch
    # emb_ref : (VPAD, E) f32 embedding table (zero rows beyond VOCAB)
    # wf_ref  : (E, NG)  input weights, fwd gates at lanes [g*GP : g*GP+H], rest 0
    # wb_ref  : (E, NG)  input weights, bwd gates at lanes [g*GP+H : g*GP+2H], rest 0
    # whh_ref : (GP, NG) block-diagonal hidden weights (padding rows/cols are 0)
    # bih_ref / bhh_ref : (1, NG) padded biases
    # wfc_ref : (GP, C) zero-padded final linear, bfc_ref : (1, C)
    # p_ref / q_ref : (T*BB, NG) f32 VMEM scratch for the batched input projections
    TB = T * BB

    # --- 1) embedding gather fused as a one-hot matmul (dropout == identity in eval) ---
    tok = tok_ref[...]                                               # (TB, 1) int32
    iota = lax.broadcasted_iota(jnp.int32, (TB, VPAD), 1)
    onehot = (iota == tok).astype(jnp.float32)                       # (TB, VPAD)
    x_all = jnp.dot(onehot, emb_ref[...],
                    preferred_element_type=jnp.float32)              # (TB, E)

    # --- 2) input projections batched over all time steps, hoisted out of the
    #        recurrence; staged in VMEM scratch so they are not held live in vregs.
    #        fwd & bwd weights occupy disjoint lanes, so the per-step sum below is exact.
    p_ref[...] = (jnp.dot(x_all, wf_ref[...], preferred_element_type=jnp.float32)
                  + bih_ref[...])                                    # fwd proj + both biases
    q_ref[...] = jnp.dot(x_all, wb_ref[...], preferred_element_type=jnp.float32)

    # --- 3) merged forward+backward GRU recurrence, fully unrolled (static T) ----------
    # PyTorch gate order (r, z, n) with b_hn inside the r * (.) term.
    whh = whh_ref[...]
    bhh = bhh_ref[...]
    h = jnp.zeros((BB, GP), jnp.float32)      # init_hidden -> zeros (both directions)
    acc = jnp.zeros((BB, GP), jnp.float32)    # running sum for mean pooling
    for s in range(T):
        g = (p_ref[pl.ds(s * BB, BB), :]
             + q_ref[pl.ds((T - 1 - s) * BB, BB), :])                # (BB, NG)
        gh = jnp.dot(h, whh, preferred_element_type=jnp.float32) + bhh
        r = jax.nn.sigmoid(g[:, 0 * GP:1 * GP] + gh[:, 0 * GP:1 * GP])   # [r_f|r_b|0]
        z = jax.nn.sigmoid(g[:, 1 * GP:2 * GP] + gh[:, 1 * GP:2 * GP])   # [z_f|z_b|0]
        n = jnp.tanh(g[:, 2 * GP:3 * GP] + r * gh[:, 2 * GP:3 * GP])     # [n_f|n_b|0]
        h = (1.0 - z) * n + z * h             # padding lanes stay exactly 0
        acc = acc + h

    # --- 4) mean pooling over time + final linear ---------------------------------------
    # [h_f | h_b] is already contiguous in lanes 0:2H -> no concatenate; wfc is padded
    # with zero rows so the matmul absorbs the padding lanes for free.
    # TODO(synk): word_pooling == 'max' would carry a running max instead of a sum;
    #             encoder_type == 'LSTM' variant not implemented (config chose GRU).
    wv_full = acc * jnp.float32(1.0 / T)                             # (BB, GP)
    wv_ref[...] = wv_full[:, 0:2 * H]
    logit_ref[...] = (jnp.dot(wv_full, wfc_ref[...],
                              preferred_element_type=jnp.float32) + bfc_ref[...])


# ----------------------------- weight packing (one-time) ------------------------
def _place_gates(w, lane_off):
    """w: (rows, 3H) in PyTorch gate order (r,z,n) -> (rows, NG); gate g placed at
    lanes [g*GP+lane_off : g*GP+lane_off+H]; all other lanes exactly 0."""
    out = jnp.zeros((w.shape[0], NG), jnp.float32)
    for g in range(3):
        out = out.at[:, g * GP + lane_off: g * GP + lane_off + H].set(
            w[:, g * H:(g + 1) * H].astype(jnp.float32))
    return out


def pack_kernel_params(p):
    """Build the lane-padded / block-diagonal kernel weights once, outside the hot path."""
    whh_pad = jnp.zeros((GP, NG), jnp.float32)
    whh_pad = whh_pad.at[0:H, :].set(_place_gates(p["whh_f"], 0))        # h_fwd rows
    whh_pad = whh_pad.at[H:2 * H, :].set(_place_gates(p["whh_b"], H))    # h_bwd rows
    emb_pad = jnp.zeros((VPAD, E), jnp.float32).at[0:VOCAB, :].set(
        p["embedding"].astype(jnp.float32))
    wfc_pad = jnp.zeros((GP, C), jnp.float32).at[0:2 * H, :].set(
        p["wfc"].astype(jnp.float32))
    # TODO(synk): on v6e, cast the matmul weight operands to bf16 (f32 accumulation kept)
    #             to halve weight DMA bytes; kept f32 here for a tight numerics check.
    return {
        "emb": emb_pad,
        "wf": _place_gates(p["wih_f"], 0),
        "wb": _place_gates(p["wih_b"], H),
        "whh": whh_pad,
        "bih": _place_gates(p["bih_f"], 0) + _place_gates(p["bih_b"], H),
        "bhh": _place_gates(p["bhh_f"], 0) + _place_gates(p["bhh_b"], H),
        "wfc": wfc_pad,
        "bfc": p["bfc"].astype(jnp.float32),
    }


# ----------------------------- forward (single pallas_call) ---------------------
@jax.jit
def rnn_pooling_forward(tokens, kp):
    """tokens: (T, batch) int32. Returns (logit (batch, C), word_vectors (batch, 2H))."""
    t_len, b_size = tokens.shape          # static under jit; t_len == T
    nb = pl.cdiv(b_size, BB)
    b_pad = nb * BB
    tok_p = jnp.zeros((t_len, b_pad), jnp.int32).at[:, 0:b_size].set(tokens)
    # per-block token layout: (nb, T*BB, 1) with row = t*BB + local_batch
    tok_blocks = tok_p.reshape(t_len, nb, BB).transpose(1, 0, 2).reshape(nb, t_len * BB, 1)

    const2 = lambda g: (0, 0)             # weights: same (full) block for every grid step
    logit_b, wv_b = pl.pallas_call(
        rnn_pooling_kernel,
        out_shape=(
            jax.ShapeDtypeStruct((nb, BB, C), jnp.float32),        # logit blocks
            jax.ShapeDtypeStruct((nb, BB, 2 * H), jnp.float32),    # word_vector blocks
        ),
        grid=(nb,),
        in_specs=[
            pl.BlockSpec((None, T * BB, 1), lambda g: (g, 0, 0)),  # tokens (per block)
            pl.BlockSpec((VPAD, E), const2),                       # embedding table
            pl.BlockSpec((E, NG), const2),                         # wf
            pl.BlockSpec((E, NG), const2),                         # wb
            pl.BlockSpec((GP, NG), const2),                        # whh (block-diagonal)
            pl.BlockSpec((1, NG), const2),                         # bih
            pl.BlockSpec((1, NG), const2),                         # bhh
            pl.BlockSpec((GP, C), const2),                         # wfc (zero-padded rows)
            pl.BlockSpec((1, C), const2),                          # bfc
        ],
        out_specs=(
            pl.BlockSpec((None, BB, C), lambda g: (g, 0, 0)),
            pl.BlockSpec((None, BB, 2 * H), lambda g: (g, 0, 0)),
        ),
        scratch_shapes=[
            pltpu.VMEM((T * BB, NG), jnp.float32),   # p: fwd input projections (+ biases)
            pltpu.VMEM((T * BB, NG), jnp.float32),   # q: bwd input projections
        ],
        compiler_params=pltpu.CompilerParams(dimension_semantics=("parallel",)),
    )(tok_blocks, kp["emb"], kp["wf"], kp["wb"], kp["whh"],
      kp["bih"], kp["bhh"], kp["wfc"], kp["bfc"])

    logit = logit_b.reshape(b_pad, C)[0:b_size]
    wv = wv_b.reshape(b_pad, 2 * H)[0:b_size]
    return logit, wv


# ----------------------------- pure-JAX reference -------------------------------
def rnn_pooling_reference(tokens, params):
    b_size = tokens.shape[1]
    embedded = jnp.take(params["embedding"], tokens, axis=0).astype(jnp.float32)

    def gru_cell(x_t, h_prev, wih, whh, bih, bhh):
        gi = x_t @ wih + bih
        gh = h_prev @ whh + bhh
        i_r, i_z, i_n = gi[:, :H], gi[:, H:2 * H], gi[:, 2 * H:]
        h_r, h_z, h_n = gh[:, :H], gh[:, H:2 * H], gh[:, 2 * H:]
        r = jax.nn.sigmoid(i_r + h_r)
        z = jax.nn.sigmoid(i_z + h_z)
        n = jnp.tanh(i_n + r * h_n)
        return (1.0 - z) * n + z * h_prev

    def run(xs, wih, whh, bih, bhh):
        def step(h, x_t):
            h = gru_cell(x_t, h, wih, whh, bih, bhh)
            return h, h
        _, hs = lax.scan(step, jnp.zeros((b_size, H), jnp.float32), xs)
        return hs

    hs_f = run(embedded, params["wih_f"], params["whh_f"], params["bih_f"], params["bhh_f"])
    hs_b = run(embedded[::-1], params["wih_b"], params["whh_b"], params["bih_b"], params["bhh_b"])[::-1]
    out = jnp.concatenate([hs_f, hs_b], axis=-1)     # (T, B, 2H)
    wv = jnp.mean(out, axis=0)                       # (B, 2H)
    logit = wv @ params["wfc"] + params["bfc"]
    return logit, wv


# ----------------------------- parameter init -----------------------------------
def init_params(key):
    ks = jax.random.split(key, 12)
    k_gru = 1.0 / jnp.sqrt(H)
    k_fc = 1.0 / jnp.sqrt(2.0 * H)

    def u(k, shape, bound):
        return jax.random.uniform(k, shape, jnp.float32, -bound, bound)

    return {
        "embedding": jax.random.normal(ks[0], (VOCAB, E), jnp.float32),
        # forward-direction GRU (weights pre-transposed to (in, 3H); gate order r,z,n)
        "wih_f": u(ks[1], (E, 3 * H), k_gru),
        "whh_f": u(ks[2], (H, 3 * H), k_gru),
        "bih_f": u(ks[3], (1, 3 * H), k_gru),
        "bhh_f": u(ks[4], (1, 3 * H), k_gru),
        # backward-direction GRU
        "wih_b": u(ks[5], (E, 3 * H), k_gru),
        "whh_b": u(ks[6], (H, 3 * H), k_gru),
        "bih_b": u(ks[7], (1, 3 * H), k_gru),
        "bhh_b": u(ks[8], (1, 3 * H), k_gru),
        # final_linear: (2H -> C)
        "wfc": u(ks[9], (2 * H, C), k_fc),
        "bfc": u(ks[10], (1, C), k_fc),
    }


if __name__ == "__main__":
    key = jax.random.PRNGKey(0)
    pkey, tkey = jax.random.split(key)
    params = init_params(pkey)
    tokens = jax.random.randint(tkey, (T, B), 0, VOCAB, dtype=jnp.int32)

    packed = pack_kernel_params(params)   # one-time weight layout transform

    logit, wv = rnn_pooling_forward(tokens, packed)
    logit = jax.block_until_ready(logit)
    wv = jax.block_until_ready(wv)

    ref_logit, ref_wv = rnn_pooling_reference(tokens, params)
    assert logit.shape == (B, C) and wv.shape == (B, 2 * H)
    assert jnp.allclose(logit, ref_logit, atol=1e-4, rtol=1e-4)
    assert jnp.allclose(wv, ref_wv, atol=1e-4, rtol=1e-4)

    print("KERNEL_OK")
</pallas_src>

<mosaic_0001>
module attributes {stable_mosaic.version = 11 : i64} {
  func.func @rnn_pooling_kernel(%arg0: i32, %arg1: memref<1x64x1xi32, #tpu.memory_space<vmem>>, %arg2: memref<128x32xf32, #tpu.memory_space<vmem>>, %arg3: memref<32x384xf32, #tpu.memory_space<vmem>>, %arg4: memref<32x384xf32, #tpu.memory_space<vmem>>, %arg5: memref<128x384xf32, #tpu.memory_space<vmem>>, %arg6: memref<1x384xf32, #tpu.memory_space<vmem>>, %arg7: memref<1x384xf32, #tpu.memory_space<vmem>>, %arg8: memref<128x4xf32, #tpu.memory_space<vmem>>, %arg9: memref<1x4xf32, #tpu.memory_space<vmem>>, %arg10: memref<1x8x4xf32, #tpu.memory_space<vmem>>, %arg11: memref<1x8x64xf32, #tpu.memory_space<vmem>>, %arg12: memref<64x384xf32, #tpu.memory_space<vmem>>, %arg13: memref<64x384xf32, #tpu.memory_space<vmem>>) attributes {dimension_semantics = [#tpu.dimension_semantics<parallel>], iteration_bounds = array<i64: 2>, scalar_prefetch = 0 : i64, scratch_operands = 2 : i64, tpu.core_type = #tpu.core_type<tc>, window_params = [{transform_indices = @transform_0, window_bounds = array<i64: 1, 64, 1>}, {pipeline_mode = #tpu.pipeline_mode<synchronous>, transform_indices = @transform_1, window_bounds = array<i64: 128, 32>}, {pipeline_mode = #tpu.pipeline_mode<synchronous>, transform_indices = @transform_2, window_bounds = array<i64: 32, 384>}, {pipeline_mode = #tpu.pipeline_mode<synchronous>, transform_indices = @transform_3, window_bounds = array<i64: 32, 384>}, {pipeline_mode = #tpu.pipeline_mode<synchronous>, transform_indices = @transform_4, window_bounds = array<i64: 128, 384>}, {pipeline_mode = #tpu.pipeline_mode<synchronous>, transform_indices = @transform_5, window_bounds = array<i64: 1, 384>}, {pipeline_mode = #tpu.pipeline_mode<synchronous>, transform_indices = @transform_6, window_bounds = array<i64: 1, 384>}, {pipeline_mode = #tpu.pipeline_mode<synchronous>, transform_indices = @transform_7, window_bounds = array<i64: 128, 4>}, {pipeline_mode = #tpu.pipeline_mode<synchronous>, transform_indices = @transform_8, window_bounds = array<i64: 1, 4>}, {transform_indices = @transform_9, window_bounds = array<i64: 1, 8, 4>}, {transform_indices = @transform_10, window_bounds = array<i64: 1, 8, 64>}]} {
    %c0 = arith.constant 0 : index
    %c0_0 = arith.constant 0 : index
    %c0_1 = arith.constant 0 : index
    %0 = vector.load %arg1[%c0, %c0_0, %c0_1] : memref<1x64x1xi32, #tpu.memory_space<vmem>>, vector<1x64x1xi32>
    %1 = vector.shape_cast %0 : vector<1x64x1xi32> to vector<64x1xi32>
    %2 = tpu.iota {dimensions = array<i32: 1>} : vector<64x128xi32>
    %3 = vector.broadcast %1 : vector<64x1xi32> to vector<64x128xi32>
    %4 = arith.cmpi eq, %2, %3 : vector<64x128xi32>
    %5 = arith.extui %4 : vector<64x128xi1> to vector<64x128xi32>
    %6 = arith.sitofp %5 : vector<64x128xi32> to vector<64x128xf32>
    %c0_2 = arith.constant 0 : index
    %c0_3 = arith.constant 0 : index
    %7 = vector.load %arg2[%c0_2, %c0_3] : memref<128x32xf32, #tpu.memory_space<vmem>>, vector<128x32xf32>
    %cst = arith.constant dense<0.000000e+00> : vector<64x32xf32>
    %8 = tpu.matmul %6, %7, %cst {dimension_numbers = #tpu.dot_dimension_numbers<[1], [0], [0], [1], [0, 0, 1, 1], [], []>} : vector<64x128xf32>, vector<128x32xf32>, vector<64x32xf32> -> vector<64x32xf32>
    %c0_4 = arith.constant 0 : index
    %c0_5 = arith.constant 0 : index
    %9 = vector.load %arg3[%c0_4, %c0_5] : memref<32x384xf32, #tpu.memory_space<vmem>>, vector<32x384xf32>
    %cst_6 = arith.constant dense<0.000000e+00> : vector<64x384xf32>
    %10 = tpu.matmul %8, %9, %cst_6 {dimension_numbers = #tpu.dot_dimension_numbers<[1], [0], [0], [1], [0, 0, 1, 1], [], []>} : vector<64x32xf32>, vector<32x384xf32>, vector<64x384xf32> -> vector<64x384xf32>
    %c0_7 = arith.constant 0 : index
    %c0_8 = arith.constant 0 : index
    %11 = vector.load %arg6[%c0_7, %c0_8] : memref<1x384xf32, #tpu.memory_space<vmem>>, vector<1x384xf32>
    %12 = vector.broadcast %11 : vector<1x384xf32> to vector<64x384xf32>
    %13 = arith.addf %10, %12 : vector<64x384xf32>
    %c0_9 = arith.constant 0 : index
    %c0_10 = arith.constant 0 : index
    %14 = vector.load %arg12[%c0_9, %c0_10] : memref<64x384xf32, #tpu.memory_space<vmem>>, vector<64x384xf32>
    tpu.vector_store %arg12[%c0_9, %c0_10], %13 {strides = array<i32>} : memref<64x384xf32, #tpu.memory_space<vmem>>, vector<64x384xf32>,
    %c0_11 = arith.constant 0 : index
    %c0_12 = arith.constant 0 : index
    %15 = vector.load %arg4[%c0_11, %c0_12] : memref<32x384xf32, #tpu.memory_space<vmem>>, vector<32x384xf32>
    %cst_13 = arith.constant dense<0.000000e+00> : vector<64x384xf32>
    %16 = tpu.matmul %8, %15, %cst_13 {dimension_numbers = #tpu.dot_dimension_numbers<[1], [0], [0], [1], [0, 0, 1, 1], [], []>} : vector<64x32xf32>, vector<32x384xf32>, vector<64x384xf32> -> vector<64x384xf32>
    %c0_14 = arith.constant 0 : index
    %c0_15 = arith.constant 0 : index
    %17 = vector.load %arg13[%c0_14, %c0_15] : memref<64x384xf32, #tpu.memory_space<vmem>>, vector<64x384xf32>
    tpu.vector_store %arg13[%c0_14, %c0_15], %16 {strides = array<i32>} : memref<64x384xf32, #tpu.memory_space<vmem>>, vector<64x384xf32>,
    %c0_16 = arith.constant 0 : index
    %c0_17 = arith.constant 0 : index
    %18 = vector.load %arg5[%c0_16, %c0_17] : memref<128x384xf32, #tpu.memory_space<vmem>>, vector<128x384xf32>
    %c0_18 = arith.constant 0 : index
    %c0_19 = arith.constant 0 : index
    %19 = vector.load %arg7[%c0_18, %c0_19] : memref<1x384xf32, #tpu.memory_space<vmem>>, vector<1x384xf32>
    %cst_20 = arith.constant 0.000000e+00 : f32
    %20 = vector.broadcast %cst_20 : f32 to vector<8x128xf32>
    %cst_21 = arith.constant 0.000000e+00 : f32
    %21 = vector.broadcast %cst_21 : f32 to vector<8x128xf32>
    %c0_22 = arith.constant 0 : index
    %c0_23 = arith.constant 0 : index
    %22 = vector.load %arg12[%c0_22, %c0_23] : memref<64x384xf32, #tpu.memory_space<vmem>>, vector<8x384xf32>
    %c56 = arith.constant 56 : index
    %c0_24 = arith.constant 0 : index
    %23 = vector.load %arg13[%c56, %c0_24] : memref<64x384xf32, #tpu.memory_space<vmem>>, vector<8x384xf32>
    %24 = arith.addf %22, %23 : vector<8x384xf32>
    %cst_25 = arith.constant dense<0.000000e+00> : vector<8x384xf32>
    %25 = tpu.matmul %20, %18, %cst_25 {dimension_numbers = #tpu.dot_dimension_numbers<[1], [0], [0], [1], [0, 0, 1, 1], [], []>} : vector<8x128xf32>, vector<128x384xf32>, vector<8x384xf32> -> vector<8x384xf32>
    %26 = vector.broadcast %19 : vector<1x384xf32> to vector<8x384xf32>
    %27 = arith.addf %25, %26 : vector<8x384xf32>
    %28 = vector.extract_strided_slice %24 {offsets = [0, 0], sizes = [8, 128], strides = [1, 1]} : vector<8x384xf32> to vector<8x128xf32>
    %29 = vector.extract_strided_slice %27 {offsets = [0, 0], sizes = [8, 128], strides = [1, 1]} : vector<8x384xf32> to vector<8x128xf32>
    %30 = arith.addf %28, %29 : vector<8x128xf32>
    %31 = arith.negf %30 : vector<8x128xf32>
    %32 = math.exp %31 : vector<8x128xf32>
    %cst_26 = arith.constant 1.000000e+00 : f32
    %33 = vector.broadcast %cst_26 : f32 to vector<8x128xf32>
    %34 = arith.addf %33, %32 : vector<8x128xf32>
    %35 = arith.divf %33, %34 : vector<8x128xf32>
    %36 = vector.extract_strided_slice %24 {offsets = [0, 128], sizes = [8, 128], strides = [1, 1]} : vector<8x384xf32> to vector<8x128xf32>
    %37 = vector.extract_strided_slice %27 {offsets = [0, 128], sizes = [8, 128], strides = [1, 1]} : vector<8x384xf32> to vector<8x128xf32>
    %38 = arith.addf %36, %37 : vector<8x128xf32>
    %39 = arith.negf %38 : vector<8x128xf32>
    %40 = math.exp %39 : vector<8x128xf32>
    %cst_27 = arith.constant 1.000000e+00 : f32
    %41 = vector.broadcast %cst_27 : f32 to vector<8x128xf32>
    %42 = arith.addf %41, %40 : vector<8x128xf32>
    %43 = arith.divf %41, %42 : vector<8x128xf32>
    %44 = vector.extract_strided_slice %24 {offsets = [0, 256], sizes = [8, 128], strides = [1, 1]} : vector<8x384xf32> to vector<8x128xf32>
    %45 = vector.extract_strided_slice %27 {offsets = [0, 256], sizes = [8, 128], strides = [1, 1]} : vector<8x384xf32> to vector<8x128xf32>
    %46 = arith.mulf %35, %45 : vector<8x128xf32>
    %47 = arith.addf %44, %46 : vector<8x128xf32>
    %48 = math.tanh %47 : vector<8x128xf32>
    %cst_28 = arith.constant 1.000000e+00 : f32
    %49 = vector.broadcast %cst_28 : f32 to vector<8x128xf32>
    %50 = arith.subf %49, %43 : vector<8x128xf32>
    %51 = arith.mulf %50, %48 : vector<8x128xf32>
    %52 = arith.mulf %43, %20 : vector<8x128xf32>
    %53 = arith.addf %51, %52 : vector<8x128xf32>
    %54 = arith.addf %21, %53 : vector<8x128xf32>
    %c8 = arith.constant 8 : index
    %c0_29 = arith.constant 0 : index
    %55 = vector.load %arg12[%c8, %c0_29] : memref<64x384xf32, #tpu.memory_space<vmem>>, vector<8x384xf32>
    %c48 = arith.constant 48 : index
    %c0_30 = arith.constant 0 : index
    %56 = vector.load %arg13[%c48, %c0_30] : memref<64x384xf32, #tpu.memory_space<vmem>>, vector<8x384xf32>
    %57 = arith.addf %55, %56 : vector<8x384xf32>
    %cst_31 = arith.constant dense<0.000000e+00> : vector<8x384xf32>
    %58 = tpu.matmul %53, %18, %cst_31 {dimension_numbers = #tpu.dot_dimension_numbers<[1], [0], [0], [1], [0, 0, 1, 1], [], []>} : vector<8x128xf32>, vector<128x384xf32>, vector<8x384xf32> -> vector<8x384xf32>
    %59 = vector.broadcast %19 : vector<1x384xf32> to vector<8x384xf32>
    %60 = arith.addf %58, %59 : vector<8x384xf32>
    %61 = vector.extract_strided_slice %57 {offsets = [0, 0], sizes = [8, 128], strides = [1, 1]} : vector<8x384xf32> to vector<8x128xf32>
    %62 = vector.extract_strided_slice %60 {offsets = [0, 0], sizes = [8, 128], strides = [1, 1]} : vector<8x384xf32> to vector<8x128xf32>
    %63 = arith.addf %61, %62 : vector<8x128xf32>
    %64 = arith.negf %63 : vector<8x128xf32>
    %65 = math.exp %64 : vector<8x128xf32>
    %cst_32 = arith.constant 1.000000e+00 : f32
    %66 = vector.broadcast %cst_32 : f32 to vector<8x128xf32>
    %67 = arith.addf %66, %65 : vector<8x128xf32>
    %68 = arith.divf %66, %67 : vector<8x128xf32>
    %69 = vector.extract_strided_slice %57 {offsets = [0, 128], sizes = [8, 128], strides = [1, 1]} : vector<8x384xf32> to vector<8x128xf32>
    %70 = vector.extract_strided_slice %60 {offsets = [0, 128], sizes = [8, 128], strides = [1, 1]} : vector<8x384xf32> to vector<8x128xf32>
    %71 = arith.addf %69, %70 : vector<8x128xf32>
    %72 = arith.negf %71 : vector<8x128xf32>
    %73 = math.exp %72 : vector<8x128xf32>
    %cst_33 = arith.constant 1.000000e+00 : f32
    %74 = vector.broadcast %cst_33 : f32 to vector<8x128xf32>
    %75 = arith.addf %74, %73 : vector<8x128xf32>
    %76 = arith.divf %74, %75 : vector<8x128xf32>
    %77 = vector.extract_strided_slice %57 {offsets = [0, 256], sizes = [8, 128], strides = [1, 1]} : vector<8x384xf32> to vector<8x128xf32>
    %78 = vector.extract_strided_slice %60 {offsets = [0, 256], sizes = [8, 128], strides = [1, 1]} : vector<8x384xf32> to vector<8x128xf32>
    %79 = arith.mulf %68, %78 : vector<8x128xf32>
    %80 = arith.addf %77, %79 : vector<8x128xf32>
    %81 = math.tanh %80 : vector<8x128xf32>
    %cst_34 = arith.constant 1.000000e+00 : f32
    %82 = vector.broadcast %cst_34 : f32 to vector<8x128xf32>
    %83 = arith.subf %82, %76 : vector<8x128xf32>
    %84 = arith.mulf %83, %81 : vector<8x128xf32>
    %85 = arith.mulf %76, %53 : vector<8x128xf32>
    %86 = arith.addf %84, %85 : vector<8x128xf32>
    %87 = arith.addf %54, %86 : vector<8x128xf32>
    %c16 = arith.constant 16 : index
    %c0_35 = arith.constant 0 : index
    %88 = vector.load %arg12[%c16, %c0_35] : memref<64x384xf32, #tpu.memory_space<vmem>>, vector<8x384xf32>
    %c40 = arith.constant 40 : index
    %c0_36 = arith.constant 0 : index
    %89 = vector.load %arg13[%c40, %c0_36] : memref<64x384xf32, #tpu.memory_space<vmem>>, vector<8x384xf32>
    %90 = arith.addf %88, %89 : vector<8x384xf32>
    %cst_37 = arith.constant dense<0.000000e+00> : vector<8x384xf32>
    %91 = tpu.matmul %86, %18, %cst_37 {dimension_numbers = #tpu.dot_dimension_numbers<[1], [0], [0], [1], [0, 0, 1, 1], [], []>} : vector<8x128xf32>, vector<128x384xf32>, vector<8x384xf32> -> vector<8x384xf32>
    %92 = vector.broadcast %19 : vector<1x384xf32> to vector<8x384xf32>
    %93 = arith.addf %91, %92 : vector<8x384xf32>
    %94 = vector.extract_strided_slice %90 {offsets = [0, 0], sizes = [8, 128], strides = [1, 1]} : vector<8x384xf32> to vector<8x128xf32>
    %95 = vector.extract_strided_slice %93 {offsets = [0, 0], sizes = [8, 128], strides = [1, 1]} : vector<8x384xf32> to vector<8x128xf32>
    %96 = arith.addf %94, %95 : vector<8x128xf32>
    %97 = arith.negf %96 : vector<8x128xf32>
    %98 = math.exp %97 : vector<8x128xf32>
    %cst_38 = arith.constant 1.000000e+00 : f32
    %99 = vector.broadcast %cst_38 : f32 to vector<8x128xf32>
    %100 = arith.addf %99, %98 : vector<8x128xf32>
    %101 = arith.divf %99, %100 : vector<8x128xf32>
    %102 = vector.extract_strided_slice %90 {offsets = [0, 128], sizes = [8, 128], strides = [1, 1]} : vector<8x384xf32> to vector<8x128xf32>
    %103 = vector.extract_strided_slice %93 {offsets = [0, 128], sizes = [8, 128], strides = [1, 1]} : vector<8x384xf32> to vector<8x128xf32>
    %104 = arith.addf %102, %103 : vector<8x128xf32>
    %105 = arith.negf %104 : vector<8x128xf32>
    %106 = math.exp %105 : vector<8x128xf32>
    %cst_39 = arith.constant 1.000000e+00 : f32
    %107 = vector.broadcast %cst_39 : f32 to vector<8x128xf32>
    %108 = arith.addf %107, %106 : vector<8x128xf32>
    %109 = arith.divf %107, %108 : vector<8x128xf32>
    %110 = vector.extract_strided_slice %90 {offsets = [0, 256], sizes = [8, 128], strides = [1, 1]} : vector<8x384xf32> to vector<8x128xf32>
    %111 = vector.extract_strided_slice %93 {offsets = [0, 256], sizes = [8, 128], strides = [1, 1]} : vector<8x384xf32> to vector<8x128xf32>
    %112 = arith.mulf %101, %111 : vector<8x128xf32>
    %113 = arith.addf %110, %112 : vector<8x128xf32>
    %114 = math.tanh %113 : vector<8x128xf32>
    %cst_40 = arith.constant 1.000000e+00 : f32
    %115 = vector.broadcast %cst_40 : f32 to vector<8x128xf32>
    %116 = arith.subf %115, %109 : vector<8x128xf32>
    %117 = arith.mulf %116, %114 : vector<8x128xf32>
    %118 = arith.mulf %109, %86 : vector<8x128xf32>
    %119 = arith.addf %117, %118 : vector<8x128xf32>
    %120 = arith.addf %87, %119 : vector<8x128xf32>
    %c24 = arith.constant 24 : index
    %c0_41 = arith.constant 0 : index
    %121 = vector.load %arg12[%c24, %c0_41] : memref<64x384xf32, #tpu.memory_space<vmem>>, vector<8x384xf32>
    %c32 = arith.constant 32 : index
    %c0_42 = arith.constant 0 : index
    %122 = vector.load %arg13[%c32, %c0_42] : memref<64x384xf32, #tpu.memory_space<vmem>>, vector<8x384xf32>
    %123 = arith.addf %121, %122 : vector<8x384xf32>
    %cst_43 = arith.constant dense<0.000000e+00> : vector<8x384xf32>
    %124 = tpu.matmul %119, %18, %cst_43 {dimension_numbers = #tpu.dot_dimension_numbers<[1], [0], [0], [1], [0, 0, 1, 1], [], []>} : vector<8x128xf32>, vector<128x384xf32>, vector<8x384xf32> -> vector<8x384xf32>
    %125 = vector.broadcast %19 : vector<1x384xf32> to vector<8x384xf32>
    %126 = arith.addf %124, %125 : vector<8x384xf32>
    %127 = vector.extract_strided_slice %123 {offsets = [0, 0], sizes = [8, 128], strides = [1, 1]} : vector<8x384xf32> to vector<8x128xf32>
    %128 = vector.extract_strided_slice %126 {offsets = [0, 0], sizes = [8, 128], strides = [1, 1]} : vector<8x384xf32> to vector<8x128xf32>
    %129 = arith.addf %127, %128 : vector<8x128xf32>
    %130 = arith.negf %129 : vector<8x128xf32>
    %131 = math.exp %130 : vector<8x128xf32>
    %cst_44 = arith.constant 1.000000e+00 : f32
    %132 = vector.broadcast %cst_44 : f32 to vector<8x128xf32>
    %133 = arith.addf %132, %131 : vector<8x128xf32>
    %134 = arith.divf %132, %133 : vector<8x128xf32>
    %135 = vector.extract_strided_slice %123 {offsets = [0, 128], sizes = [8, 128], strides = [1, 1]} : vector<8x384xf32> to vector<8x128xf32>
    %136 = vector.extract_strided_slice %126 {offsets = [0, 128], sizes = [8, 128], strides = [1, 1]} : vector<8x384xf32> to vector<8x128xf32>
    %137 = arith.addf %135, %136 : vector<8x128xf32>
    %138 = arith.negf %137 : vector<8x128xf32>
    %139 = math.exp %138 : vector<8x128xf32>
    %cst_45 = arith.constant 1.000000e+00 : f32
    %140 = vector.broadcast %cst_45 : f32 to vector<8x128xf32>
    %141 = arith.addf %140, %139 : vector<8x128xf32>
    %142 = arith.divf %140, %141 : vector<8x128xf32>
    %143 = vector.extract_strided_slice %123 {offsets = [0, 256], sizes = [8, 128], strides = [1, 1]} : vector<8x384xf32> to vector<8x128xf32>
    %144 = vector.extract_strided_slice %126 {offsets = [0, 256], sizes = [8, 128], strides = [1, 1]} : vector<8x384xf32> to vector<8x128xf32>
    %145 = arith.mulf %134, %144 : vector<8x128xf32>
    %146 = arith.addf %143, %145 : vector<8x128xf32>
    %147 = math.tanh %146 : vector<8x128xf32>
    %cst_46 = arith.constant 1.000000e+00 : f32
    %148 = vector.broadcast %cst_46 : f32 to vector<8x128xf32>
    %149 = arith.subf %148, %142 : vector<8x128xf32>
    %150 = arith.mulf %149, %147 : vector<8x128xf32>
    %151 = arith.mulf %142, %119 : vector<8x128xf32>
    %152 = arith.addf %150, %151 : vector<8x128xf32>
    %153 = arith.addf %120, %152 : vector<8x128xf32>
    %c32_47 = arith.constant 32 : index
    %c0_48 = arith.constant 0 : index
    %154 = vector.load %arg12[%c32_47, %c0_48] : memref<64x384xf32, #tpu.memory_space<vmem>>, vector<8x384xf32>
    %c24_49 = arith.constant 24 : index
    %c0_50 = arith.constant 0 : index
    %155 = vector.load %arg13[%c24_49, %c0_50] : memref<64x384xf32, #tpu.memory_space<vmem>>, vector<8x384xf32>
    %156 = arith.addf %154, %155 : vector<8x384xf32>
    %cst_51 = arith.constant dense<0.000000e+00> : vector<8x384xf32>
    %157 = tpu.matmul %152, %18, %cst_51 {dimension_numbers = #tpu.dot_dimension_numbers<[1], [0], [0], [1], [0, 0, 1, 1], [], []>} : vector<8x128xf32>, vector<128x384xf32>, vector<8x384xf32> -> vector<8x384xf32>
    %158 = vector.broadcast %19 : vector<1x384xf32> to vector<8x384xf32>
    %159 = arith.addf %157, %158 : vector<8x384xf32>
    %160 = vector.extract_strided_slice %156 {offsets = [0, 0], sizes = [8, 128], strides = [1, 1]} : vector<8x384xf32> to vector<8x128xf32>
    %161 = vector.extract_strided_slice %159 {offsets = [0, 0], sizes = [8, 128], strides = [1, 1]} : vector<8x384xf32> to vector<8x128xf32>
    %162 = arith.addf %160, %161 : vector<8x128xf32>
    %163 = arith.negf %162 : vector<8x128xf32>
    %164 = math.exp %163 : vector<8x128xf32>
    %cst_52 = arith.constant 1.000000e+00 : f32
    %165 = vector.broadcast %cst_52 : f32 to vector<8x128xf32>
    %166 = arith.addf %165, %164 : vector<8x128xf32>
    %167 = arith.divf %165, %166 : vector<8x128xf32>
    %168 = vector.extract_strided_slice %156 {offsets = [0, 128], sizes = [8, 128], strides = [1, 1]} : vector<8x384xf32> to vector<8x128xf32>
    %169 = vector.extract_strided_slice %159 {offsets = [0, 128], sizes = [8, 128], strides = [1, 1]} : vector<8x384xf32> to vector<8x128xf32>
    %170 = arith.addf %168, %169 : vector<8x128xf32>
    %171 = arith.negf %170 : vector<8x128xf32>
    %172 = math.exp %171 : vector<8x128xf32>
    %cst_53 = arith.constant 1.000000e+00 : f32
    %173 = vector.broadcast %cst_53 : f32 to vector<8x128xf32>
    %174 = arith.addf %173, %172 : vector<8x128xf32>
    %175 = arith.divf %173, %174 : vector<8x128xf32>
    %176 = vector.extract_strided_slice %156 {offsets = [0, 256], sizes = [8, 128], strides = [1, 1]} : vector<8x384xf32> to vector<8x128xf32>
    %177 = vector.extract_strided_slice %159 {offsets = [0, 256], sizes = [8, 128], strides = [1, 1]} : vector<8x384xf32> to vector<8x128xf32>
    %178 = arith.mulf %167, %177 : vector<8x128xf32>
    %179 = arith.addf %176, %178 : vector<8x128xf32>
    %180 = math.tanh %179 : vector<8x128xf32>
    %cst_54 = arith.constant 1.000000e+00 : f32
    %181 = vector.broadcast %cst_54 : f32 to vector<8x128xf32>
    %182 = arith.subf %181, %175 : vector<8x128xf32>
    %183 = arith.mulf %182, %180 : vector<8x128xf32>
    %184 = arith.mulf %175, %152 : vector<8x128xf32>
    %185 = arith.addf %183, %184 : vector<8x128xf32>
    %186 = arith.addf %153, %185 : vector<8x128xf32>
    %c40_55 = arith.constant 40 : index
    %c0_56 = arith.constant 0 : index
    %187 = vector.load %arg12[%c40_55, %c0_56] : memref<64x384xf32, #tpu.memory_space<vmem>>, vector<8x384xf32>
    %c16_57 = arith.constant 16 : index
    %c0_58 = arith.constant 0 : index
    %188 = vector.load %arg13[%c16_57, %c0_58] : memref<64x384xf32, #tpu.memory_space<vmem>>, vector<8x384xf32>
    %189 = arith.addf %187, %188 : vector<8x384xf32>
    %cst_59 = arith.constant dense<0.000000e+00> : vector<8x384xf32>
    %190 = tpu.matmul %185, %18, %cst_59 {dimension_numbers = #tpu.dot_dimension_numbers<[1], [0], [0], [1], [0, 0, 1, 1], [], []>} : vector<8x128xf32>, vector<128x384xf32>, vector<8x384xf32> -> vector<8x384xf32>
    %191 = vector.broadcast %19 : vector<1x384xf32> to vector<8x384xf32>
    %192 = arith.addf %190, %191 : vector<8x384xf32>
    %193 = vector.extract_strided_slice %189 {offsets = [0, 0], sizes = [8, 128], strides = [1, 1]} : vector<8x384xf32> to vector<8x128xf32>
    %194 = vector.extract_strided_slice %192 {offsets = [0, 0], sizes = [8, 128], strides = [1, 1]} : vector<8x384xf32> to vector<8x128xf32>
    %195 = arith.addf %193, %194 : vector<8x128xf32>
    %196 = arith.negf %195 : vector<8x128xf32>
    %197 = math.exp %196 : vector<8x128xf32>
    %cst_60 = arith.constant 1.000000e+00 : f32
    %198 = vector.broadcast %cst_60 : f32 to vector<8x128xf32>
    %199 = arith.addf %198, %197 : vector<8x128xf32>
    %200 = arith.divf %198, %199 : vector<8x128xf32>
    %201 = vector.extract_strided_slice %189 {offsets = [0, 128], sizes = [8, 128], strides = [1, 1]} : vector<8x384xf32> to vector<8x128xf32>
    %202 = vector.extract_strided_slice %192 {offsets = [0, 128], sizes = [8, 128], strides = [1, 1]} : vector<8x384xf32> to vector<8x128xf32>
    %203 = arith.addf %201, %202 : vector<8x128xf32>
    %204 = arith.negf %203 : vector<8x128xf32>
    %205 = math.exp %204 : vector<8x128xf32>
    %cst_61 = arith.constant 1.000000e+00 : f32
    %206 = vector.broadcast %cst_61 : f32 to vector<8x128xf32>
    %207 = arith.addf %206, %205 : vector<8x128xf32>
    %208 = arith.divf %206, %207 : vector<8x128xf32>
    %209 = vector.extract_strided_slice %189 {offsets = [0, 256], sizes = [8, 128], strides = [1, 1]} : vector<8x384xf32> to vector<8x128xf32>
    %210 = vector.extract_strided_slice %192 {offsets = [0, 256], sizes = [8, 128], strides = [1, 1]} : vector<8x384xf32> to vector<8x128xf32>
    %211 = arith.mulf %200, %210 : vector<8x128xf32>
    %212 = arith.addf %209, %211 : vector<8x128xf32>
    %213 = math.tanh %212 : vector<8x128xf32>
    %cst_62 = arith.constant 1.000000e+00 : f32
    %214 = vector.broadcast %cst_62 : f32 to vector<8x128xf32>
    %215 = arith.subf %214, %208 : vector<8x128xf32>
    %216 = arith.mulf %215, %213 : vector<8x128xf32>
    %217 = arith.mulf %208, %185 : vector<8x128xf32>
    %218 = arith.addf %216, %217 : vector<8x128xf32>
    %219 = arith.addf %186, %218 : vector<8x128xf32>
    %c48_63 = arith.constant 48 : index
    %c0_64 = arith.constant 0 : index
    %220 = vector.load %arg12[%c48_63, %c0_64] : memref<64x384xf32, #tpu.memory_space<vmem>>, vector<8x384xf32>
    %c8_65 = arith.constant 8 : index
    %c0_66 = arith.constant 0 : index
    %221 = vector.load %arg13[%c8_65, %c0_66] : memref<64x384xf32, #tpu.memory_space<vmem>>, vector<8x384xf32>
    %222 = arith.addf %220, %221 : vector<8x384xf32>
    %cst_67 = arith.constant dense<0.000000e+00> : vector<8x384xf32>
    %223 = tpu.matmul %218, %18, %cst_67 {dimension_numbers = #tpu.dot_dimension_numbers<[1], [0], [0], [1], [0, 0, 1, 1], [], []>} : vector<8x128xf32>, vector<128x384xf32>, vector<8x384xf32> -> vector<8x384xf32>
    %224 = vector.broadcast %19 : vector<1x384xf32> to vector<8x384xf32>
    %225 = arith.addf %223, %224 : vector<8x384xf32>
    %226 = vector.extract_strided_slice %222 {offsets = [0, 0], sizes = [8, 128], strides = [1, 1]} : vector<8x384xf32> to vector<8x128xf32>
    %227 = vector.extract_strided_slice %225 {offsets = [0, 0], sizes = [8, 128], strides = [1, 1]} : vector<8x384xf32> to vector<8x128xf32>
    %228 = arith.addf %226, %227 : vector<8x128xf32>
    %229 = arith.negf %228 : vector<8x128xf32>
    %230 = math.exp %229 : vector<8x128xf32>
    %cst_68 = arith.constant 1.000000e+00 : f32
    %231 = vector.broadcast %cst_68 : f32 to vector<8x128xf32>
    %232 = arith.addf %231, %230 : vector<8x128xf32>
    %233 = arith.divf %231, %232 : vector<8x128xf32>
    %234 = vector.extract_strided_slice %222 {offsets = [0, 128], sizes = [8, 128], strides = [1, 1]} : vector<8x384xf32> to vector<8x128xf32>
    %235 = vector.extract_strided_slice %225 {offsets = [0, 128], sizes = [8, 128], strides = [1, 1]} : vector<8x384xf32> to vector<8x128xf32>
    %236 = arith.addf %234, %235 : vector<8x128xf32>
    %237 = arith.negf %236 : vector<8x128xf32>
    %238 = math.exp %237 : vector<8x128xf32>
    %cst_69 = arith.constant 1.000000e+00 : f32
    %239 = vector.broadcast %cst_69 : f32 to vector<8x128xf32>
    %240 = arith.addf %239, %238 : vector<8x128xf32>
    %241 = arith.divf %239, %240 : vector<8x128xf32>
    %242 = vector.extract_strided_slice %222 {offsets = [0, 256], sizes = [8, 128], strides = [1, 1]} : vector<8x384xf32> to vector<8x128xf32>
    %243 = vector.extract_strided_slice %225 {offsets = [0, 256], sizes = [8, 128], strides = [1, 1]} : vector<8x384xf32> to vector<8x128xf32>
    %244 = arith.mulf %233, %243 : vector<8x128xf32>
    %245 = arith.addf %242, %244 : vector<8x128xf32>
    %246 = math.tanh %245 : vector<8x128xf32>
    %cst_70 = arith.constant 1.000000e+00 : f32
    %247 = vector.broadcast %cst_70 : f32 to vector<8x128xf32>
    %248 = arith.subf %247, %241 : vector<8x128xf32>
    %249 = arith.mulf %248, %246 : vector<8x128xf32>
    %250 = arith.mulf %241, %218 : vector<8x128xf32>
    %251 = arith.addf %249, %250 : vector<8x128xf32>
    %252 = arith.addf %219, %251 : vector<8x128xf32>
    %c56_71 = arith.constant 56 : index
    %c0_72 = arith.constant 0 : index
    %253 = vector.load %arg12[%c56_71, %c0_72] : memref<64x384xf32, #tpu.memory_space<vmem>>, vector<8x384xf32>
    %c0_73 = arith.constant 0 : index
    %c0_74 = arith.constant 0 : index
    %254 = vector.load %arg13[%c0_73, %c0_74] : memref<64x384xf32, #tpu.memory_space<vmem>>, vector<8x384xf32>
    %255 = arith.addf %253, %254 : vector<8x384xf32>
    %cst_75 = arith.constant dense<0.000000e+00> : vector<8x384xf32>
    %256 = tpu.matmul %251, %18, %cst_75 {dimension_numbers = #tpu.dot_dimension_numbers<[1], [0], [0], [1], [0, 0, 1, 1], [], []>} : vector<8x128xf32>, vector<128x384xf32>, vector<8x384xf32> -> vector<8x384xf32>
    %257 = vector.broadcast %19 : vector<1x384xf32> to vector<8x384xf32>
    %258 = arith.addf %256, %257 : vector<8x384xf32>
    %259 = vector.extract_strided_slice %255 {offsets = [0, 0], sizes = [8, 128], strides = [1, 1]} : vector<8x384xf32> to vector<8x128xf32>
    %260 = vector.extract_strided_slice %258 {offsets = [0, 0], sizes = [8, 128], strides = [1, 1]} : vector<8x384xf32> to vector<8x128xf32>
    %261 = arith.addf %259, %260 : vector<8x128xf32>
    %262 = arith.negf %261 : vector<8x128xf32>
    %263 = math.exp %262 : vector<8x128xf32>
    %cst_76 = arith.constant 1.000000e+00 : f32
    %264 = vector.broadcast %cst_76 : f32 to vector<8x128xf32>
    %265 = arith.addf %264, %263 : vector<8x128xf32>
    %266 = arith.divf %264, %265 : vector<8x128xf32>
    %267 = vector.extract_strided_slice %255 {offsets = [0, 128], sizes = [8, 128], strides = [1, 1]} : vector<8x384xf32> to vector<8x128xf32>
    %268 = vector.extract_strided_slice %258 {offsets = [0, 128], sizes = [8, 128], strides = [1, 1]} : vector<8x384xf32> to vector<8x128xf32>
    %269 = arith.addf %267, %268 : vector<8x128xf32>
    %270 = arith.negf %269 : vector<8x128xf32>
    %271 = math.exp %270 : vector<8x128xf32>
    %cst_77 = arith.constant 1.000000e+00 : f32
    %272 = vector.broadcast %cst_77 : f32 to vector<8x128xf32>
    %273 = arith.addf %272, %271 : vector<8x128xf32>
    %274 = arith.divf %272, %273 : vector<8x128xf32>
    %275 = vector.extract_strided_slice %255 {offsets = [0, 256], sizes = [8, 128], strides = [1, 1]} : vector<8x384xf32> to vector<8x128xf32>
    %276 = vector.extract_strided_slice %258 {offsets = [0, 256], sizes = [8, 128], strides = [1, 1]} : vector<8x384xf32> to vector<8x128xf32>
    %277 = arith.mulf %266, %276 : vector<8x128xf32>
    %278 = arith.addf %275, %277 : vector<8x128xf32>
    %279 = math.tanh %278 : vector<8x128xf32>
    %cst_78 = arith.constant 1.000000e+00 : f32
    %280 = vector.broadcast %cst_78 : f32 to vector<8x128xf32>
    %281 = arith.subf %280, %274 : vector<8x128xf32>
    %282 = arith.mulf %281, %279 : vector<8x128xf32>
    %283 = arith.mulf %274, %251 : vector<8x128xf32>
    %284 = arith.addf %282, %283 : vector<8x128xf32>
    %285 = arith.addf %252, %284 : vector<8x128xf32>
    %cst_79 = arith.constant 1.250000e-01 : f32
    %286 = vector.broadcast %cst_79 : f32 to vector<8x128xf32>
    %287 = arith.mulf %285, %286 : vector<8x128xf32>
    %288 = vector.extract_strided_slice %287 {offsets = [0, 0], sizes = [8, 64], strides = [1, 1]} : vector<8x128xf32> to vector<8x64xf32>
    %c0_80 = arith.constant 0 : index
    %c0_81 = arith.constant 0 : index
    %c0_82 = arith.constant 0 : index
    %289 = vector.load %arg11[%c0_80, %c0_81, %c0_82] : memref<1x8x64xf32, #tpu.memory_space<vmem>>, vector<1x8x64xf32>
    %290 = vector.shape_cast %289 : vector<1x8x64xf32> to vector<8x64xf32>
    %291 = vector.shape_cast %288 : vector<8x64xf32> to vector<1x8x64xf32>
    tpu.vector_store %arg11[%c0_80, %c0_81, %c0_82], %291 {strides = array<i32>} : memref<1x8x64xf32, #tpu.memory_space<vmem>>, vector<1x8x64xf32>,
    %c0_83 = arith.constant 0 : index
    %c0_84 = arith.constant 0 : index
    %292 = vector.load %arg8[%c0_83, %c0_84] : memref<128x4xf32, #tpu.memory_space<vmem>>, vector<128x4xf32>
    %cst_85 = arith.constant dense<0.000000e+00> : vector<8x4xf32>
    %293 = tpu.matmul %287, %292, %cst_85 {dimension_numbers = #tpu.dot_dimension_numbers<[1], [0], [0], [1], [0, 0, 1, 1], [], []>} : vector<8x128xf32>, vector<128x4xf32>, vector<8x4xf32> -> vector<8x4xf32>
    %c0_86 = arith.constant 0 : index
    %c0_87 = arith.constant 0 : index
    %294 = vector.load %arg9[%c0_86, %c0_87] : memref<1x4xf32, #tpu.memory_space<vmem>>, vector<1x4xf32>
    %295 = vector.broadcast %294 : vector<1x4xf32> to vector<8x4xf32>
    %296 = arith.addf %293, %295 : vector<8x4xf32>
    %c0_88 = arith.constant 0 : index
    %c0_89 = arith.constant 0 : index
    %c0_90 = arith.constant 0 : index
    %297 = vector.load %arg10[%c0_88, %c0_89, %c0_90] : memref<1x8x4xf32, #tpu.memory_space<vmem>>, vector<1x8x4xf32>
    %298 = vector.shape_cast %297 : vector<1x8x4xf32> to vector<8x4xf32>
    %299 = vector.shape_cast %296 : vector<8x4xf32> to vector<1x8x4xf32>
    tpu.vector_store %arg10[%c0_88, %c0_89, %c0_90], %299 {strides = array<i32>} : memref<1x8x4xf32, #tpu.memory_space<vmem>>, vector<1x8x4xf32>,
    return
  }
  func.func @transform_0(%arg0: i32) -> (i32, i32, i32) {
    %c0_i32 = arith.constant 0 : i32
    %c0_i32_0 = arith.constant 0 : i32
    %c0_i32_1 = arith.constant 0 : i32
    return %arg0, %c0_i32, %c0_i32_0 : i32, i32, i32
  }
  func.func @transform_1(%arg0: i32) -> (i32, i32) {
    %c0_i32 = arith.constant 0 : i32
    %c0_i32_0 = arith.constant 0 : i32
    %c0_i32_1 = arith.constant 0 : i32
    return %c0_i32, %c0_i32_0 : i32, i32
  }
  func.func @transform_2(%arg0: i32) -> (i32, i32) {
    %c0_i32 = arith.constant 0 : i32
    %c0_i32_0 = arith.constant 0 : i32
    %c0_i32_1 = arith.constant 0 : i32
    return %c0_i32, %c0_i32_0 : i32, i32
  }
  func.func @transform_3(%arg0: i32) -> (i32, i32) {
    %c0_i32 = arith.constant 0 : i32
    %c0_i32_0 = arith.constant 0 : i32
    %c0_i32_1 = arith.constant 0 : i32
    return %c0_i32, %c0_i32_0 : i32, i32
  }
  func.func @transform_4(%arg0: i32) -> (i32, i32) {
    %c0_i32 = arith.constant 0 : i32
    %c0_i32_0 = arith.constant 0 : i32
    %c0_i32_1 = arith.constant 0 : i32
    return %c0_i32, %c0_i32_0 : i32, i32
  }
  func.func @transform_5(%arg0: i32) -> (i32, i32) {
    %c0_i32 = arith.constant 0 : i32
    %c0_i32_0 = arith.constant 0 : i32
    %c0_i32_1 = arith.constant 0 : i32
    return %c0_i32, %c0_i32_0 : i32, i32
  }
  func.func @transform_6(%arg0: i32) -> (i32, i32) {
    %c0_i32 = arith.constant 0 : i32
    %c0_i32_0 = arith.constant 0 : i32
    %c0_i32_1 = arith.constant 0 : i32
    return %c0_i32, %c0_i32_0 : i32, i32
  }
  func.func @transform_7(%arg0: i32) -> (i32, i32) {
    %c0_i32 = arith.constant 0 : i32
    %c0_i32_0 = arith.constant 0 : i32
    %c0_i32_1 = arith.constant 0 : i32
    return %c0_i32, %c0_i32_0 : i32, i32
  }
  func.func @transform_8(%arg0: i32) -> (i32, i32) {
    %c0_i32 = arith.constant 0 : i32
    %c0_i32_0 = arith.constant 0 : i32
    %c0_i32_1 = arith.constant 0 : i32
    return %c0_i32, %c0_i32_0 : i32, i32
  }
  func.func @transform_9(%arg0: i32) -> (i32, i32, i32) {
    %c0_i32 = arith.constant 0 : i32
    %c0_i32_0 = arith.constant 0 : i32
    %c0_i32_1 = arith.constant 0 : i32
    return %arg0, %c0_i32, %c0_i32_0 : i32, i32, i32
  }
  func.func @transform_10(%arg0: i32) -> (i32, i32, i32) {
    %c0_i32 = arith.constant 0 : i32
    %c0_i32_0 = arith.constant 0 : i32
    %c0_i32_1 = arith.constant 0 : i32
    return %arg0, %c0_i32, %c0_i32_0 : i32, i32, i32
  }
}

</mosaic_0001>

<bundles_post_ra>
// kernel: rnn_pooling_forward.1
= control target key start
LH: loop header
LB: loop body
LE: loop exit
PB: predicated region body
PF: predicated region fallthrough
CT: control target
= control target key end

     0   :  { %s5299_s0 = inlined_call_operand.vmem [shape: s32[2,64,1], index: 0, kind: input, shape index: {}]   ;;  %s5300_s1 = inlined_call_operand.vmem [shape: f32[128,32], index: 1, kind: input, shape index: {}]   ;;  %s5301_s2 = inlined_call_operand.vmem [shape: f32[32,384], index: 2, kind: input, shape index: {}]   ;;  %s5302_s3 = inlined_call_operand.hbm [shape: f32[32,384], index: 3, kind: input, shape index: {}]   ;;  %s5303_s4 = inlined_call_operand.vmem [shape: f32[128,384], index: 4, kind: input, shape index: {}]   ;;  %s5304_s5 = inlined_call_operand.vmem [shape: f32[1,384], index: 5, kind: input, shape index: {}]   ;;  %s5305_s6 = inlined_call_operand.vmem [shape: f32[1,384], index: 6, kind: input, shape index: {}]   ;;  %s5306_s7 = inlined_call_operand.vmem [shape: f32[128,4], index: 7, kind: input, shape index: {}]   ;;  %s5307_s8 = inlined_call_operand.vmem [shape: f32[1,4], index: 8, kind: input, shape index: {}]   ;;  %s5308_s9 = inlined_call_operand.vmem [shape: f32[2,8,4], index: 9, kind: output, shape index: {0}]   ;;  %s5309_s10 = inlined_call_operand.hbm [shape: f32[2,8,64], index: 10, kind: output, shape index: {1}]  }
   0x1   :  { %5313 = sst [smem:[#allocation10_spill]] %s5299_s0 }
   0x2   :  { %5314 = sst [smem:[#allocation11_spill]] %s5300_s1 }
   0x3   :  { %5315 = sst [smem:[#allocation12_spill]] %s5301_s2 }
   0x4   :  { %16 = vsyncpa [#allocation5], 0 }
   0x5   :  { %17 = vsyncpa [#allocation6], 0 }
   0x6   :  { %19 = vsyncpa [#allocation6 + $0x1], 0  ;;  %s4347_s13 = smov 0   ;;  %s4349_s14 = smov 0  }
   0x7   :  { %s4351_s15 = smov 0   ;;  %s4353_s16 = smov 0  }
   0x8 LB: > { %s4368_s17 = sadd.s32 4294967295, %s4281_s16   ;;  %s2768_s18 = sadd.s32 4294967294, %s4281_s16   ;;  %s4281_s16 = sphi %s4353_s16, %s5331_s16   ;;  %s4277_s15 = sphi %s4351_s15, %s5330_s15   ;;  %s4273_s14 = sphi %s4349_s14, %s5329_s14   ;;  %s4269_s13 = sphi %s4347_s13, %s5328_s13  }
   0x9   : > { %s4372_s19 = sadd.s32 1, %s4281_s16   ;;  %s252_s20 = sadd.s32 1, %s4277_s15 }
   0xa   : > { %s249_s21 = ssub.s32 %s4281_s16, %s4372_s19  ;;  %p262_p0 = scmp.ne.s32.totalorder %s4277_s15, %s4273_s14 }
   0xb   : > { %p250_p1 = scmp.eq.s32.totalorder %s249_s21, 0  ;;  %p263_p2 = scmp.eq.s32.totalorder %s4368_s17, 1 }
   0xc   : > { %p268_p3 = scmp.ne.s32.totalorder %s4273_s14, %s4269_s13  ;;  %p269_p4 = scmp.eq.s32.totalorder %s2768_s18, 1 }
   0xd   : > { %s4383_s22 = scalar_select %p250_p1, %s4277_s15, %s252_s20  }
   0xe   : > { %p4385_p5 = por %p263_p2, %p262_p0  ;;  %p4389_p6 = por %p269_p4, %p268_p3 }
   0xf   : > { %p2769_p7 = scmp.ge.s32.totalorder %s4281_s16, 1  ;;  %p276_p8 = scmp.lt.s32.totalorder %s4281_s16, 3 }
  0x10   : > { %s5316_s23 = scalar_select %p4385_p5, 1, 0 }
  0x11   : > { %s5317_s24 = scalar_select %p4389_p6, 1, 0 }
  0x12   : > { %p5310_p9 = scmp.eq.s32.totalorder %s4368_s17, 0  ;;  %p4396_p10 = pnand %p2769_p7, %p276_p8 }
  0x13   : > { %s4283_s26 = smov [#allocation4]   ;;  %s4187_s11 = scalar_lea.hbm %s5302_s3, 1536 }
  0x14   : > { %s5318_s25 = scalar_select %p4396_p10, 1, 0 }
  0x15   : > { %s294_s27 = sshll.u32 %s4283_s26, 4  ;;  %p4054_p11 = pneg %p4396_p10  ;;  %s295_s27 = int_to_ptr.vmem [resolvable:$true] %s294_s27 }
  0x16   : > { %p4188_p13 = scmp.ne.s32.totalorder %s5302_s3, %s4187_s11  ;;  %p4194_p3 = scmp.lt.u32.totalorder %s4187_s11, %s5302_s3 }
  0x17   : > { %p4404_p12 = pnand %p5310_p9, %p4054_p11 }
  0x19   : > { %p4189_p0 = pneg %p4404_p12 }
  0x1b   : > { %p4190_p1 = pnand %p4189_p0, %p4188_p13 }
  0x1d   : > { %p4191_p2 = pneg %p4190_p1 }
  0x1f   : > { %p4196_p4 = pnand %p4194_p3, %p4191_p2 }
  0x21   : > { %4199 = shalt.err (!%p4196_p4)
}
  0x22   : > { %s4200_s26 = scalar_lea.vmem %s295_s27, 1536  ;;  %p4208_p9 = scmp.lt.s32.totalorder %s295_s27, %s295_s27 }
  0x23   : > { %p4201_p7 = scmp.ne.s32.totalorder %s295_s27, %s4200_s26  ;;  %p4209_p6 = scmp.lt.s32.totalorder %s4200_s26, %s4200_s26 }
  0x25   : > { %p4203_p8 = pnand %p4201_p7, %p4189_p0  ;;  %p4210_p5 = por %p4209_p6, %p4208_p9 }
  0x27   : > { %p4204_p11 = pneg %p4203_p8 }
  0x29   : > { %p4211_p10 = pnand %p4210_p5, %p4204_p11 }
  0x2b   : > { %4214 = shalt.err (!%p4211_p10)
}
  0x2c   : > { %s4284_s29 = smov 384   ;;  %s4285_s30 = smov 24  }
  0x2d   : > { %4057 = dma.hbm_to_vmem [thread:$0]  (!%p4404_p12), %s5302_s3, 1536, %s295_s27, [#allocation5], %s4284_s29, %s4284_s29, %s4285_s30  }
  0x2e   : > { %p5320_p13 = scmp.ne.s32.totalorder %s5318_s25, 0 }
  0x2f   : > { %p5321_p1 = scmp.eq.s32.totalorder (!%p5320_p13), %s4368_s17, 0 }
  0x30   : > { %333 = sbr.rel (%p5320_p13) target bundleno = 2785 (0xae1), region = 56 }
  0x37   : > { %4260 = dma.done.wait (%p5321_p1), [#allocation5], 1536   ;;  %p5322_p0 = pmov %p5321_p1 }
  0x38   : > { %p375_p5 = scmp.lt.s32.totalorder %s4368_s17, 1  ;;  %v4286_v0 = vmov 0   ;;  %s5323_s0 = sld [smem:[#allocation10_spill]]  ;;  %v861_v45 = vld [vmem:[#allocation4 + $0x10] sm:$0xff]  ;;  %v864_v46 = vld [vmem:[#allocation4 + $0x28] sm:$0xff]  ;;  %v392_v48 = vlaneseq  ;;  %v867_v52 = vld [vmem:[#allocation4 + $0x40] sm:$0xff] }
  0x39   : > { %4262 = vsyncadd (%p5322_p0), [#allocation5], 4294965760  ;;  %4106 = vset.pattern.permute.xlu1 %v4286_v0  ;;  %4105 = vset.pattern.permute.xlu0 %v4286_v0  ;;  %s5324_s1 = sld [smem:[#allocation11_spill]]  ;;  %s5325_s2 = sld [smem:[#allocation12_spill]]  ;;  %v3504_v47 = vpack.c.bf16 %v864_v46, %v861_v45  ;;  %v870_v53 = vld [vmem:[#allocation4 + $0x58] sm:$0xff]  ;;  %v4287_v54 = vmov 1.0  }
  0x3a   : > { %s4432_s28 = scalar_select %p375_p5, %s4368_s17, 1  ;;  %v393_v49 = vand.u32 127, %v392_v48  ;;  %v3508_v57 = vpack.c.bf16 %v870_v53, %v867_v52  ;;  %v4288_v62 = vmov 0.0   ;;  %vm592_vm8 = vcmask 261120  }
  0x3b   : > { %681 = vmatprep.mubr.f32.mxu1 %v4288_v62  ;;  %vm4290_vm9 = vmmov 0   ;;  %s372_s29 = sand.u32 1, %s4273_s14   ;;  %vm2555_vm10 = vcmask 523264   ;;  %s2844_s18 = sshll.u32 %s4368_s17, 7 }
  0x3c   : > { %s2847_s11 = sshll.u32 %s4432_s28, 6  ;;  %s2774_s30 = sshll.u32 %s372_s29, 3 }
  0x3d   : > { %s374_s12 = scalar_lea.vmem [#allocation7], %s2774_s30  ;;  %s5256_s20 = scalar_lea.hbm %s5309_s10, %s2844_s18 }
  0x3e   : > { %s379_s25 = scalar_lea.vmem %s5323_s0, %s2847_s11  ;;  %s2673_s0 = sshll.u32 %s374_s12, 4  ;;  %s2674_s0 = int_to_ptr.vmem [resolvable:$true] %s2673_s0 }
  0x3f   : > { %v386_v1 = vld [vmem:[%s379_s25 + $0x10] sm:$0xff]  ;;  %v384_v2 = vld [vmem:[%s379_s25] sm:$0xff]  ;;  %v387_v3 = vld [vmem:[%s379_s25 + $0x18] sm:$0xff]  ;;  %s2657_s21 = scalar_lea.sflag [#allocation6], %s372_s29  ;;  %s4215_s26 = scalar_lea.vmem %s2674_s0, 128 }
  0x40   : > { %401 = vperm.xlu1 %4106, %v386_v1   ;;  %395 = vperm.xlu0 %4105, %v384_v2   ;;  %v385_v4 = vld [vmem:[%s379_s25 + $0x8] sm:$0xff]  ;;  %v442_v5 = vld [vmem:[%s5324_s1] sm:$0xff]  ;;  %v444_v7 = vld [vmem:[%s5324_s1 + $0x10] sm:$0xff]  ;;  %v4289_v2 = vmov 0.0|0.0   ;;  %p4216_p6 = scmp.ne.s32.totalorder %s2674_s0, %s4215_s26  ;;  %p5326_p9 = scmp.ne.s32.totalorder %s5316_s23, 0 }
  0x41   : > { %v443_v6 = vld [vmem:[%s5324_s1 + $0x8] sm:$0xff]  ;;  %v445_v8 = vld [vmem:[%s5324_s1 + $0x18] sm:$0xff]  ;;  %v446_v11 = vld [vmem:[%s5324_s1 + $0x20] sm:$0xff] }
  0x42   : > { %v3448_v9 = vpack.c.bf16 %v443_v6, %v442_v5  ;;  %v3452_v10 = vpack.c.bf16 %v445_v8, %v444_v7  ;;  %v447_v12 = vld [vmem:[%s5324_s1 + $0x28] sm:$0xff]  ;;  %v388_v14 = vld [vmem:[%s379_s25 + $0x20] sm:$0xff]  ;;  %v448_v16 = vld [vmem:[%s5324_s1 + $0x30] sm:$0xff]  ;;  %p4217_p10 = pnand %p4216_p6, %p5326_p9 }
  0x43   : > { %v389_v13 = vld [vmem:[%s379_s25 + $0x28] sm:$0xff]  ;;  %v3456_v15 = vpack.c.bf16 %v447_v12, %v446_v11  ;;  %v449_v17 = vld [vmem:[%s5324_s1 + $0x38] sm:$0xff]  ;;  %v390_v19 = vld [vmem:[%s379_s25 + $0x30] sm:$0xff] }
  0x44   : > { %404 = vperm.xlu1 %4106, %v387_v3   ;;  %398 = vperm.xlu0 %4105, %v385_v4   ;;  %v391_v18 = vld [vmem:[%s379_s25 + $0x38] sm:$0xff]  ;;  %v3460_v20 = vpack.c.bf16 %v449_v17, %v448_v16  ;;  %v450_v21 = vld [vmem:[%s5324_s1 + $0x40] sm:$0xff]  ;;  %v451_v22 = vld [vmem:[%s5324_s1 + $0x48] sm:$0xff]  ;;  %p4218_p12 = pneg %p4217_p10  ;;  %s4291_s25 = smov [#allocation7]  }
  0x45   : > { %3449 = vmatprep.subr.bf16.mxu0 %v3448_v9  ;;  %v3464_v23 = vpack.c.bf16 %v451_v22, %v450_v21  ;;  %v452_v24 = vld [vmem:[%s5324_s1 + $0x50] sm:$0xff]  ;;  %v453_v25 = vld [vmem:[%s5324_s1 + $0x58] sm:$0xff]  ;;  %v564_v26 = vld [vmem:[%s5325_s2 + $0x8] sm:$0xff] }
  0x46   : > { %3451 = vmatpush3.bf16.msra.mxu0 %v3448_v9  ;;  %v567_v27 = vld [vmem:[%s5325_s2 + $0x20] sm:$0xff]  ;;  %v566_v30 = vld [vmem:[%s5325_s2 + $0x18] sm:$0xff]  ;;  %v3468_v31 = vpack.c.bf16 %v453_v25, %v452_v24  ;;  %v573_v34 = vld [vmem:[%s5325_s2 + $0x50] sm:$0xff] }
  0x47   : > { %3453 = vmatprep.subr.bf16.mxu0 %v3452_v10  ;;  %v563_v28 = vld [vmem:[%s5325_s2] sm:$0xff]  ;;  %v3480_v29 = vpack.c.bf16 %v567_v27, %v564_v26  ;;  %v570_v33 = vld [vmem:[%s5325_s2 + $0x38] sm:$0xff]  ;;  %v569_v35 = vld [vmem:[%s5325_s2 + $0x30] sm:$0xff] }
  0x48   : > { %410 = vperm.xlu1 %4106, %v389_v13   ;;  %407 = vperm.xlu0 %4105, %v388_v14   ;;  %v3482_v32 = vpack.c.bf16 %v566_v30, %v563_v28  ;;  %v454_v36 = vld [vmem:[%s5324_s1 + $0x60] sm:$0xff]  ;;  %v455_v37 = vld [vmem:[%s5324_s1 + $0x68] sm:$0xff]  ;;  %v3484_v38 = vpack.c.bf16 %v573_v34, %v570_v33  ;;  %v456_v42 = vld [vmem:[%s5324_s1 + $0x70] sm:$0xff] }
  0x49   : > { %3481 = vmatprep.subr.bf16.mxu1 %v3480_v29  ;;  %v572_v39 = vld [vmem:[%s5325_s2 + $0x48] sm:$0xff]  ;;  %v3472_v41 = vpack.c.bf16 %v455_v37, %v454_v36  ;;  %v457_v43 = vld [vmem:[%s5324_s1 + $0x78] sm:$0xff]  ;;  %v565_v63 = vld [vmem:[%s5325_s2 + $0x10] sm:$0xff]  ;;  %s4219_s1 = sshll.u32 %s4291_s25, 4  ;;  %s4220_s1 = int_to_ptr.vmem [resolvable:$false] %s4219_s1 }
  0x4a   : > { %3455 = vmatpush3.bf16.msra.mxu0 %v3452_v10  ;;  %3483 = vmatpush1.bf16.msra.mxu1 %v3482_v32  ;;  %v3486_v40 = vpack.c.bf16 %v572_v39, %v569_v35  ;;  %v3476_v44 = vpack.c.bf16 %v457_v43, %v456_v42  ;;  %v568_v0 = vld [vmem:[%s5325_s2 + $0x28] sm:$0xff]  ;;  %v571_v3 = vld [vmem:[%s5325_s2 + $0x40] sm:$0xff]  ;;  %v574_v4 = vld [vmem:[%s5325_s2 + $0x58] sm:$0xff]  ;;  %s4221_s2 = scalar_lea.vmem %s4220_s1, 256  ;;  %p4222_p2 = scmp.lt.s32.totalorder %s2674_s0, %s4220_s1 }
  0x4b   : > { %3457 = vmatprep.subr.bf16.mxu0 %v3456_v15  ;;  %3485 = vmatprep.subr.bf16.mxu1 %v3484_v38  ;;  %v3488_v1 = vpack.c.bf16 %v568_v0, %v565_v63  ;;  %v1115_v5 = vld [vmem:[%s5303_s4 + $0x10] sm:$0xff]  ;;  %v1118_v6 = vld [vmem:[%s5303_s4 + $0x28] sm:$0xff]  ;;  %v3492_v8 = vpack.c.bf16 %v574_v4, %v571_v3  ;;  %v863_v12 = vld [vmem:[#allocation4 + $0x20] sm:$0xff]  ;;  %p4223_p3 = scmp.lt.s32.totalorder %s4221_s2, %s4215_s26 }
  0x4c   : > { %416 = vperm.xlu1 %4106, %v391_v18   ;;  %413 = vperm.xlu0 %4105, %v390_v19   ;;  %v860_v10 = vld [vmem:[#allocation4 + $0x8] sm:$0xff]  ;;  %v4535_v11 = vpack.c.bf16 %v1118_v6, %v1115_v5  ;;  %v1121_v13 = vld [vmem:[%s5303_s4 + $0x40] sm:$0xff]  ;;  %v1124_v14 = vld [vmem:[%s5303_s4 + $0x58] sm:$0xff] }
  0x4d   : > { %v3496_v17 = vpack.c.bf16 %v863_v12, %v860_v10  ;;  %v4555_v18 = vpack.c.bf16 %v1124_v14, %v1121_v13  ;;  %v1127_v19 = vld [vmem:[%s5303_s4 + $0x70] sm:$0xff]  ;;  %v1133_v24 = vld [vmem:[%s5303_s4 + $0xa0] sm:$0xff]  ;;  %v1136_v25 = vld [vmem:[%s5303_s4 + $0xb8] sm:$0xff]  ;;  %p4224_p4 = por %p4223_p3, %p4222_p2 }
  0x4e   : > { %3459 = vmatpush3.bf16.msra.mxu0 %v3456_v15  ;;  %3487 = vmatpush1.bf16.msra.mxu1 %v3486_v40  ;;  %v4597_v28 = vpack.c.bf16 %v1136_v25, %v1133_v24  ;;  %v1139_v29 = vld [vmem:[%s5303_s4 + $0xd0] sm:$0xff]  ;;  %v1142_v30 = vld [vmem:[%s5303_s4 + $0xe8] sm:$0xff]  ;;  %v1145_v32 = vld [vmem:[%s5303_s4 + $0x100] sm:$0xff] }
  0x4f   : > { %3461 = vmatprep.subr.bf16.mxu0 %v3460_v20  ;;  %3489 = vmatprep.subr.bf16.mxu1 %v3488_v1  ;;  %v1148_v33 = vld [vmem:[%s5303_s4 + $0x118] sm:$0xff]  ;;  %v1151_v35 = vld [vmem:[%s5303_s4 + $0x130] sm:$0xff]  ;;  %v1154_v36 = vld [vmem:[%s5303_s4 + $0x148] sm:$0xff]  ;;  %p4225_p7 = pnand %p4224_p4, %p4218_p12 }
  0x50   : > { %v4629_v34 = vpack.c.bf16 %v1148_v33, %v1145_v32  ;;  %v4642_v37 = vpack.c.bf16 %v1154_v36, %v1151_v35  ;;  %v1157_v38 = vld [vmem:[%s5303_s4 + $0x160] sm:$0xff]  ;;  %v1160_v39 = vld [vmem:[%s5303_s4 + $0x178] sm:$0xff]  ;;  %v869_v43 = vld [vmem:[#allocation4 + $0x50] sm:$0xff] }
  0x51   : > { %v859_v40 = vld [vmem:[#allocation4] sm:$0xff]  ;;  %v866_v42 = vld [vmem:[#allocation4 + $0x38] sm:$0xff]  ;;  %v1126_v63 = vld [vmem:[%s5303_s4 + $0x68] sm:$0xff] }
  0x52   : > { %3463 = vmatpush3.bf16.msra.mxu0 %v3460_v20  ;;  %v1130_v20 = vld [vmem:[%s5303_s4 + $0x88] sm:$0xff]  ;;  %v3500_v46 = vpack.c.bf16 %v869_v43, %v866_v42  ;;  %v1129_v0 = vld [vmem:[%s5303_s4 + $0x80] sm:$0xff]  ;;  %v1128_v5 = vld [vmem:[%s5303_s4 + $0x78] sm:$0xff] }
  0x53   : > { %3465 = vmatprep.subr.bf16.mxu0 %v3464_v23  ;;  %v4734_v3 = vpack.c.bf16 %v1129_v0, %v1126_v63  ;;  %v1125_v4 = vld [vmem:[%s5303_s4 + $0x60] sm:$0xff]  ;;  %v1132_v6 = vld [vmem:[%s5303_s4 + $0x98] sm:$0xff]  ;;  %v1131_v12 = vld [vmem:[%s5303_s4 + $0x90] sm:$0xff] }
  0x54   : > { %v1138_v13 = vld [vmem:[%s5303_s4 + $0xc8] sm:$0xff]  ;;  %v1141_v14 = vld [vmem:[%s5303_s4 + $0xe0] sm:$0xff]  ;;  %v1144_v24 = vld [vmem:[%s5303_s4 + $0xf8] sm:$0xff] }
  0x55   : > { %v1147_v25 = vld [vmem:[%s5303_s4 + $0x110] sm:$0xff]  ;;  %v1150_v33 = vld [vmem:[%s5303_s4 + $0x128] sm:$0xff]  ;;  %v1153_v35 = vld [vmem:[%s5303_s4 + $0x140] sm:$0xff] }
  0x56   : > { %3467 = vmatpush3.bf16.msra.mxu0 %v3464_v23  ;;  %v4576_v23 = vpack.c.bf16 %v1130_v20, %v1127_v19  ;;  %v4780_v19 = vpack.c.bf16 %v1141_v14, %v1138_v13  ;;  %v1137_v20 = vld [vmem:[%s5303_s4 + $0xc0] sm:$0xff]  ;;  %v1143_v32 = vld [vmem:[%s5303_s4 + $0xf0] sm:$0xff] }
  0x57   : > { %3469 = vmatprep.subr.bf16.mxu0 %v3468_v31 }
  0x5a   : > { %3471 = vmatpush3.bf16.msra.mxu0 %v3468_v31  ;;  %v4616_v31 = vpack.c.bf16 %v1142_v30, %v1139_v29  ;;  %v4803_v30 = vpack.c.bf16 %v1147_v25, %v1144_v24 }
  0x5b   : > { %3473 = vmatprep.subr.bf16.mxu0 %v3472_v41 }
  0x5e   : > { %3475 = vmatpush3.bf16.msra.mxu0 %v3472_v41  ;;  %v862_v41 = vld [vmem:[#allocation4 + $0x18] sm:$0xff] }
  0x5f   : > { %3477 = vmatprep.subr.bf16.mxu0 %v3476_v44  ;;  %v3498_v45 = vpack.c.bf16 %v862_v41, %v859_v40  ;;  %v1156_v40 = vld [vmem:[%s5303_s4 + $0x158] sm:$0xff]  ;;  %v1159_v41 = vld [vmem:[%s5303_s4 + $0x170] sm:$0xff] }
  0x60   : > { %v4847_v43 = vpack.c.bf16 %v1159_v41, %v1156_v40 }
  0x62   : > { %3479 = vmatpush3.bf16.msra.mxu0 %v3476_v44  ;;  %v4655_v44 = vpack.c.bf16 %v1160_v39, %v1157_v38  ;;  %v4826_v38 = vpack.c.bf16 %v1153_v35, %v1150_v33  ;;  %v1149_v39 = vld [vmem:[%s5303_s4 + $0x120] sm:$0xff] }
  0x63   : > { %3505 = vmatprep.subr.bf16.mxu0 %v3504_v47 }
  0xbf   : > { %v402_v50 = vpop.permute.xlu1 %401  ;;  %v396_v51 = vpop.permute.xlu0 %395 }
  0xc0   : > { %vm418_vm0 = vcmp.eq.s32.totalorder %v393_v49, %v396_v51  ;;  %vm420_vm1 = vcmp.eq.s32.totalorder %v393_v49, %v402_v50  ;;  %v1114_v50 = vld [vmem:[%s5303_s4 + $0x8] sm:$0xff]  ;;  %v1117_v51 = vld [vmem:[%s5303_s4 + $0x20] sm:$0xff] }
  0xc1   : > { %3081 = vmatprep.mubr.msk.f32.mxu0 %vm418_vm0, %v4287_v54  ;;  %v4674_v53 = vpack.c.bf16 %v1117_v51, %v1114_v50 }
  0xc3   : > { %v405_v55 = vpop.permute.xlu1 %404  ;;  %v399_v56 = vpop.permute.xlu0 %398 }
  0xc4   : > { %vm419_vm2 = vcmp.eq.s32.totalorder %v393_v49, %v399_v56  ;;  %vm421_vm3 = vcmp.eq.s32.totalorder %v393_v49, %v405_v55  ;;  %v1116_v55 = vld [vmem:[%s5303_s4 + $0x18] sm:$0xff] }
  0xc5   : > { %3082 = vmatmul.mubr.msk.f32.vlgmr.msra.gmra.mrb[0].mxu0 %vm419_vm2, %v4287_v54  ;;  %v1120_v56 = vld [vmem:[%s5303_s4 + $0x38] sm:$0xff] }
  0xc6   : > { %3084 = vmatprep.mubr.msk.f32.mxu0 %vm420_vm1, %v4287_v54  ;;  %3507 = vmatpush3.bf16.msra.mxu0 %v3504_v47  ;;  %v865_v47 = vld [vmem:[#allocation4 + $0x30] sm:$0xff] }
  0xc7   : > { %v411_v58 = vpop.permute.xlu1 %410  ;;  %v408_v59 = vpop.permute.xlu0 %407  ;;  %3509 = vmatprep.subr.bf16.mxu0 %v3508_v57 }
  0xc8   : > { %vm422_vm4 = vcmp.eq.s32.totalorder %v393_v49, %v408_v59  ;;  %vm423_vm5 = vcmp.eq.s32.totalorder %v393_v49, %v411_v58 }
  0xc9   : > { %3085 = vmatmul.mubr.msk.f32.gmra.mrb[2].mxu0 %vm421_vm3, %v4287_v54 }
  0xca   : > { %3087 = vmatprep.mubr.msk.f32.mxu0 %vm422_vm4, %v4287_v54  ;;  %3511 = vmatpush3.bf16.msra.mxu0 %v3508_v57  ;;  %v1123_v57 = vld [vmem:[%s5303_s4 + $0x50] sm:$0xff] }
  0xcb   : > { %v414_v60 = vpop.permute.xlu0 %413  ;;  %v417_v61 = vpop.permute.xlu1 %416  ;;  %3544 = vmatprep.subr.bf16.mxu0 %v4289_v2  ;;  %v4711_v59 = vpack.c.bf16 %v1123_v57, %v1120_v56  ;;  %v575_v57 = vld [vmem:[%s5304_s5] sm:$0x7] }
  0xcc   : > { %vm424_vm6 = vcmp.eq.s32.totalorder %v393_v49, %v414_v60  ;;  %vm425_vm7 = vcmp.eq.s32.totalorder %v393_v49, %v417_v61  ;;  %v868_v49 = vld [vmem:[#allocation4 + $0x48] sm:$0xff]  ;;  %v1119_v60 = vld [vmem:[%s5303_s4 + $0x30] sm:$0xff] }
  0xcd   : > { %3088 = vmatmul.mubr.msk.f32.gmra.mrb[4].mxu0 %vm423_vm5, %v4287_v54  ;;  %v3502_v52 = vpack.c.bf16 %v868_v49, %v865_v47  ;;  %v1122_v61 = vld [vmem:[%s5303_s4 + $0x48] sm:$0xff] }
  0xce   : > { %3090 = vmatprep.mubr.msk.f32.mxu0 %vm424_vm6, %v4287_v54 }
  0xd1   : > { %3091 = vmatmul.mubr.msk.f32.gmra.mrb[6].mxu0 %vm425_vm7, %v4287_v54  ;;  %v1113_v54 = vld [vmem:[%s5303_s4] sm:$0xff] }
  0xd2   : > { %v4709_v58 = vpack.c.bf16 %v1116_v55, %v1113_v54  ;;  %v578_v55 = vshrl.u32 %v392_v48, 7 }
  0xd4   : > { %v587_v56 = vsub.s32 2, %v578_v55 }
 0x198   : > { %v4531_v7 = vpop.f32.mrb[0].mxu0 }
 0x199   : > { %v4533_v9 = vpop.f32.mrb[1].mxu0 }
 0x19a   : > { %2794 = vmatmul.mubr.msk.f32.vlgmr.msra.gmra.mrb[0].mxu1 %vm592_vm8, %v4533_v9  ;;  %3121 = vmatprep.mubr.msk.f32.mxu0 %vm592_vm8, %v4533_v9 }
 0x19b   : > { %3491 = vmatpush3.bf16.msra.mxu1 %v3488_v1  ;;  %3122 = vmatmul.mubr.msk.f32.vlgmr.msra.gmra.mrb[8].mxu0 %vm592_vm8, %v4531_v7  ;;  %v4731_v1 = vpack.c.bf16 %v1122_v61, %v1119_v60  ;;  %v588_v60 = vrot.slane %v575_v57, %v587_v56 }
 0x19c   : > { %v4549_v15 = vpop.f32.mrb[2].mxu0  ;;  %687 = vmatprep.mubr.f32.mxu1 %v4288_v62  ;;  %3493 = vmatprep.subr.bf16.mxu1 %v3492_v8 }
 0x19d   : > { %v4552_v16 = vpop.f32.mrb[3].mxu0  ;;  %3546 = vmatpush3.bf16.msra.mxu0 %v4535_v11 }
 0x19e   : > { %2795 = vmatmul.mubr.msk.f32.gmra.mrb[2].mxu1 %vm592_vm8, %v4531_v7  ;;  %3124 = vmatprep.mubr.msk.f32.mxu0 %vm592_vm8, %v4552_v16 }
 0x19f   : > { %3125 = vmatmul.mubr.msk.f32.gmra.mrb[10].mxu0 %vm592_vm8, %v4549_v15  ;;  %693 = vmatprep.mubr.f32.mxu1 %v4288_v62 }
 0x1a0   : > { %v4570_v21 = vpop.f32.mrb[4].mxu0  ;;  %3495 = vmatpush3.bf16.msra.mxu1 %v3492_v8  ;;  %3547 = vmatprep.subr.bf16.mxu0 %v4289_v2  ;;  %v1135_v8 = vld [vmem:[%s5303_s4 + $0xb0] sm:$0xff] }
 0x1a1   : > { %v4573_v22 = vpop.f32.mrb[5].mxu0  ;;  %3497 = vmatprep.subr.bf16.mxu1 %v3496_v17  ;;  %3549 = vmatpush3.bf16.msra.mxu0 %v4555_v18  ;;  %v4757_v10 = vpack.c.bf16 %v1135_v8, %v1132_v6 }
 0x1a2   : > { %2796 = vmatmul.mubr.msk.f32.gmra.mrb[4].mxu1 %vm592_vm8, %v4552_v16  ;;  %3127 = vmatprep.mubr.msk.f32.mxu0 %vm592_vm8, %v4573_v22 }
 0x1a3   : > { %3128 = vmatmul.mubr.msk.f32.gmra.mrb[12].mxu0 %vm592_vm8, %v4570_v21  ;;  %699 = vmatprep.mubr.f32.mxu1 %v4288_v62 }
 0x1a4   : > { %v4591_v26 = vpop.f32.mrb[6].mxu0  ;;  %3550 = vmatprep.subr.bf16.mxu0 %v4289_v2 }
 0x1a5   : > { %v4594_v27 = vpop.f32.mrb[7].mxu0  ;;  %3552 = vmatpush3.bf16.msra.mxu0 %v4576_v23 }
 0x1a6   : > { %2797 = vmatmul.mubr.msk.f32.gmra.mrb[6].mxu1 %vm592_vm8, %v4549_v15  ;;  %3130 = vmatprep.mubr.msk.f32.mxu0 %vm592_vm8, %v4594_v27 }
 0x1a7   : > { %3131 = vmatmul.mubr.msk.f32.gmra.mrb[14].mxu0 %vm592_vm8, %v4591_v26  ;;  %705 = vmatprep.mubr.f32.mxu1 %v4288_v62 }
 0x1a8   : > { %3553 = vmatprep.subr.bf16.mxu0 %v4289_v2  ;;  %3165 = vmatprep.mubr.msk.f32.mxu0 %vm4290_vm9, %v4288_v62 }
 0x1a9   : > { %3555 = vmatpush3.bf16.msra.mxu0 %v4597_v28 }
 0x1aa   : > { %2798 = vmatmul.mubr.msk.f32.gmra.mrb[8].mxu1 %vm592_vm8, %v4573_v22  ;;  %3556 = vmatprep.subr.bf16.mxu0 %v4289_v2 }
 0x1ab   : > { %711 = vmatprep.mubr.f32.mxu1 %v4288_v62 }
 0x1ad   : > { %3558 = vmatpush3.bf16.msra.mxu0 %v4616_v31 }
 0x1ae   : > { %2799 = vmatmul.mubr.msk.f32.gmra.mrb[10].mxu1 %vm592_vm8, %v4570_v21  ;;  %3559 = vmatprep.subr.bf16.mxu0 %v4289_v2 }
 0x1af   : > { %717 = vmatprep.mubr.f32.mxu1 %v4288_v62 }
 0x1b1   : > { %3561 = vmatpush3.bf16.msra.mxu0 %v4629_v34 }
 0x1b2   : > { %2800 = vmatmul.mubr.msk.f32.gmra.mrb[12].mxu1 %vm592_vm8, %v4594_v27  ;;  %3562 = vmatprep.subr.bf16.mxu0 %v4289_v2 }
 0x1b3   : > { %723 = vmatprep.mubr.f32.mxu1 %v4288_v62 }
 0x1b5   : > { %3564 = vmatpush3.bf16.msra.mxu0 %v4642_v37 }
 0x1b6   : > { %2801 = vmatmul.mubr.msk.f32.gmra.mrb[14].mxu1 %vm592_vm8, %v4591_v26  ;;  %3565 = vmatprep.subr.bf16.mxu0 %v4289_v2 }
 0x1b7   : > { %3101 = vmatprep.mubr.msk.f32.mxu1 %vm592_vm8, %v4533_v9 }
 0x1b9   : > { %3567 = vmatpush3.bf16.msra.mxu0 %v4655_v44 }
 0x1ba   : > { %3102 = vmatmul.mubr.msk.f32.vlgmr.msra.gmra.mrb[16].mxu1 %vm592_vm8, %v4531_v7  ;;  %3600 = vmatprep.subr.bf16.mxu0 %v4289_v2 }
 0x1bb   : > { %3499 = vmatpush1.bf16.msra.mxu1 %v3498_v45  ;;  %3104 = vmatprep.mubr.msk.f32.mxu1 %vm592_vm8, %v4552_v16  ;;  %v1155_v45 = vld [vmem:[%s5303_s4 + $0x150] sm:$0xff] }
 0x1bc   : > { %3501 = vmatprep.subr.bf16.mxu1 %v3500_v46  ;;  %3166 = vmatmul.mubr.f32.vlgmr.msra.gmra.mrb[16].mxu0 %v4288_v62  ;;  %v1158_v46 = vld [vmem:[%s5303_s4 + $0x168] sm:$0xff] }
 0x1bd   : > { %3602 = vmatpush3.bf16.msra.mxu0 %v4535_v11  ;;  %3200 = vmatprep.mubr.msk.f32.mxu0 %vm4290_vm9, %v4288_v62 }
 0x1be   : > { %3105 = vmatmul.mubr.msk.f32.gmra.mrb[18].mxu1 %vm592_vm8, %v4549_v15  ;;  %3603 = vmatprep.subr.bf16.mxu0 %v4289_v2 }
 0x1bf   : > { %3107 = vmatprep.mubr.msk.f32.mxu1 %vm592_vm8, %v4573_v22  ;;  %3503 = vmatpush1.bf16.msra.mxu1 %v3502_v52 }
 0x1c0   : > { %3513 = vmatprep.subr.bf16.mxu1 %v4674_v53 }
 0x1c1   : > { %3605 = vmatpush3.bf16.msra.mxu0 %v4555_v18 }
 0x1c2   : > { %3108 = vmatmul.mubr.msk.f32.gmra.mrb[20].mxu1 %vm592_vm8, %v4570_v21  ;;  %3606 = vmatprep.subr.bf16.mxu0 %v4289_v2 }
 0x1c3   : > { %3110 = vmatprep.mubr.msk.f32.mxu1 %vm592_vm8, %v4594_v27 }
 0x1c5   : > { %3608 = vmatpush3.bf16.msra.mxu0 %v4576_v23 }
 0x1c6   : > { %3111 = vmatmul.mubr.msk.f32.gmra.mrb[22].mxu1 %vm592_vm8, %v4591_v26  ;;  %3609 = vmatprep.subr.bf16.mxu0 %v4289_v2 }
 0x1c7   : > { %935 = vmatprep.mubr.f32.mxu1 %v4288_v62 }
 0x1c9   : > { %3611 = vmatpush3.bf16.msra.mxu0 %v4597_v28 }
 0x1ca   : > { %2810 = vmatmul.mubr.msk.f32.vlgmr.msra.gmra.mrb[14].mxu1 %vm592_vm8, %v4533_v9  ;;  %3612 = vmatprep.subr.bf16.mxu0 %v4289_v2  ;;  %v4754_v9 = vpack.c.bf16 %v1128_v5, %v1125_v4 }
 0x1cb   : > { %3515 = vmatpush1.bf16.msra.mxu1 %v4709_v58  ;;  %941 = vmatprep.mubr.f32.mxu1 %v4288_v62 }
 0x1cc   : > { %3517 = vmatprep.subr.bf16.mxu1 %v4711_v59 }
 0x1cd   : > { %3614 = vmatpush3.bf16.msra.mxu0 %v4616_v31 }
 0x1ce   : > { %2811 = vmatmul.mubr.msk.f32.gmra.mrb[12].mxu1 %vm592_vm8, %v4531_v7  ;;  %3615 = vmatprep.subr.bf16.mxu0 %v4289_v2  ;;  %v1134_v7 = vld [vmem:[%s5303_s4 + $0xa8] sm:$0xff] }
 0x1cf   : > { %3519 = vmatpush1.bf16.msra.mxu1 %v4731_v1  ;;  %947 = vmatprep.mubr.f32.mxu1 %v4288_v62  ;;  %v4777_v17 = vpack.c.bf16 %v1134_v7, %v1131_v12 }
 0x1d0   : > { %3521 = vmatprep.subr.bf16.mxu1 %v4734_v3 }
 0x1d1   : > { %3617 = vmatpush3.bf16.msra.mxu0 %v4629_v34 }
 0x1d2   : > { %2812 = vmatmul.mubr.msk.f32.gmra.mrb[10].mxu1 %vm592_vm8, %v4552_v16  ;;  %3618 = vmatprep.subr.bf16.mxu0 %v4289_v2  ;;  %v1140_v16 = vld [vmem:[%s5303_s4 + $0xd8] sm:$0xff] }
 0x1d3   : > { %3523 = vmatpush1.bf16.msra.mxu1 %v4754_v9  ;;  %953 = vmatprep.mubr.f32.mxu1 %v4288_v62  ;;  %v4800_v29 = vpack.c.bf16 %v1140_v16, %v1137_v20 }
 0x1d4   : > { %3525 = vmatprep.subr.bf16.mxu1 %v4757_v10 }
 0x1d5   : > { %3620 = vmatpush3.bf16.msra.mxu0 %v4642_v37 }
 0x1d6   : > { %2813 = vmatmul.mubr.msk.f32.gmra.mrb[8].mxu1 %vm592_vm8, %v4549_v15  ;;  %3621 = vmatprep.subr.bf16.mxu0 %v4289_v2  ;;  %v1146_v15 = vld [vmem:[%s5303_s4 + $0x108] sm:$0xff] }
 0x1d7   : > { %3527 = vmatpush1.bf16.msra.mxu1 %v4777_v17  ;;  %959 = vmatprep.mubr.f32.mxu1 %v4288_v62  ;;  %v4823_v36 = vpack.c.bf16 %v1146_v15, %v1143_v32 }
 0x1d8   : > { %3529 = vmatprep.subr.bf16.mxu1 %v4780_v19 }
 0x1d9   : > { %3623 = vmatpush3.bf16.msra.mxu0 %v4655_v44 }
 0x1da   : > { %2814 = vmatmul.mubr.msk.f32.gmra.mrb[6].mxu1 %vm592_vm8, %v4573_v22  ;;  %3656 = vmatprep.subr.bf16.mxu0 %v4289_v2  ;;  %v1152_v22 = vld [vmem:[%s5303_s4 + $0x138] sm:$0xff] }
 0x1db   : > { %3531 = vmatpush1.bf16.msra.mxu1 %v4800_v29  ;;  %965 = vmatprep.mubr.f32.mxu1 %v4288_v62  ;;  %v4844_v42 = vpack.c.bf16 %v1152_v22, %v1149_v39 }
 0x1dc   : > { %3533 = vmatprep.subr.bf16.mxu1 %v4803_v30 }
 0x1de   : > { %2815 = vmatmul.mubr.msk.f32.gmra.mrb[4].mxu1 %vm592_vm8, %v4570_v21  ;;  %v4859_v21 = vpack.c.bf16 %v1158_v46, %v1155_v45 }
 0x1df   : > { %971 = vmatprep.mubr.f32.mxu1 %v4288_v62  ;;  %3535 = vmatpush1.bf16.msra.mxu1 %v4823_v36 }
 0x1e0   : > { %3537 = vmatprep.subr.bf16.mxu1 %v4826_v38 }
 0x1e2   : > { %2816 = vmatmul.mubr.msk.f32.gmra.mrb[2].mxu1 %vm592_vm8, %v4594_v27 }
 0x1e3   : > { %977 = vmatprep.mubr.f32.mxu1 %v4288_v62  ;;  %3539 = vmatpush1.bf16.msra.mxu1 %v4844_v42 }
 0x1e4   : > { %3541 = vmatprep.subr.bf16.mxu1 %v4847_v43 }
 0x1e6   : > { %2817 = vmatmul.mubr.msk.f32.gmra.mrb[0].mxu1 %vm592_vm8, %v4591_v26 }
 0x1e7   : > { %3543 = vmatpush1.bf16.msra.mxu1 %v4859_v21  ;;  %1251 = vmatprep.mubr.f32.mxu1 %v4288_v62 }
 0x1e8   : > { %3569 = vmatprep.subr.bf16.mxu1 %v4674_v53 }
 0x1ee   : > { %1252 = vmatmul.mubr.f32.vlgmr.msra.gmra.mrb[0].mxu1 %v4288_v62 }
 0x1ef   : > { %3571 = vmatpush1.bf16.msra.mxu1 %v4709_v58  ;;  %1423 = vmatprep.mubr.f32.mxu1 %v4288_v62 }
 0x1f0   : > { %3573 = vmatprep.subr.bf16.mxu1 %v4711_v59 }
 0x1f3   : > { %3575 = vmatpush1.bf16.msra.mxu1 %v4731_v1 }
 0x1f4   : > { %3577 = vmatprep.subr.bf16.mxu1 %v4734_v3 }
 0x1f7   : > { %3579 = vmatpush1.bf16.msra.mxu1 %v4754_v9 }
 0x1f8   : > { %3581 = vmatprep.subr.bf16.mxu1 %v4757_v10 }
 0x1fb   : > { %3583 = vmatpush1.bf16.msra.mxu1 %v4777_v17 }
 0x1fc   : > { %3585 = vmatprep.subr.bf16.mxu1 %v4780_v19 }
 0x1ff   : > { %3587 = vmatpush1.bf16.msra.mxu1 %v4800_v29 }
 0x200   : > { %3589 = vmatprep.subr.bf16.mxu1 %v4803_v30 }
 0x203   : > { %3591 = vmatpush1.bf16.msra.mxu1 %v4823_v36 }
 0x204   : > { %3593 = vmatprep.subr.bf16.mxu1 %v4826_v38 }
 0x207   : > { %3595 = vmatpush1.bf16.msra.mxu1 %v4844_v42 }
 0x208   : > { %3597 = vmatprep.subr.bf16.mxu1 %v4847_v43 }
 0x20b   : > { %3599 = vmatpush1.bf16.msra.mxu1 %v4859_v21 }
 0x20c   : > { %3625 = vmatprep.subr.bf16.mxu1 %v4674_v53 }
 0x26e   : > { %v3123_v26 = vpop.f32.mrb[8].mxu0 }
 0x26f   : > { %v1050_v27 = vpop.f32.mrb[9].mxu0 }
 0x272   : > { %v3126_v47 = vpop.f32.mrb[10].mxu0 }
 0x273   : > { %v1060_v49 = vpop.f32.mrb[11].mxu0 }
 0x276   : > { %v3129_v50 = vpop.f32.mrb[12].mxu0 }
 0x277   : > { %v1070_v51 = vpop.f32.mrb[13].mxu0 }
 0x27a   : > { %v3132_v52 = vpop.f32.mrb[14].mxu0 }
 0x27b   : > { %v1080_v54 = vpop.f32.mrb[15].mxu0 }
 0x28d   : > { %v3103_v61 = vpop.f32.mrb[16].mxu1 }
 0x28e   : > { %v802_v63 = vadd.f32 %v3103_v61, %v588_v60  ;;  %v796_v0 = vpop.f32.mrb[17].mxu1 }
 0x28f   : > { %v797_v4 = vadd.f32 %v796_v0, %v588_v60  ;;  %v1324_v5 = vpop.f32.mrb[16].mxu0 }
 0x290   : > { %v4889_v6 = vadd.f32 %v1080_v54, %v802_v63  ;;  %v3167_v8 = vpop.f32.mrb[17].mxu0 }
 0x291   : > { %v1170_v12 = vadd.f32 %v3132_v52, %v797_v4  ;;  %v3106_v7 = vpop.f32.mrb[18].mxu1  ;;  %v583_v52 = vsub.s32 1, %v578_v55 }
 0x292   : > { %v812_v13 = vadd.f32 %v3106_v7, %v588_v60  ;;  %v806_v14 = vpop.f32.mrb[19].mxu1 }
 0x293   : > { %v807_v20 = vadd.f32 %v806_v14, %v588_v60 }
 0x294   : > { %v4891_v48 = vadd.f32 %v1070_v51, %v812_v13  ;;  %v579_v51 = vsub.s32 0, %v578_v55 }
 0x295   : > { %v4893_v16 = vadd.f32 %v3129_v50, %v807_v20  ;;  %v3109_v24 = vpop.f32.mrb[20].mxu1  ;;  %v1161_v50 = vld [vmem:[%s5305_s6] sm:$0x7] }
 0x296   : > { %v822_v25 = vadd.f32 %v3109_v24, %v588_v60  ;;  %v816_v32 = vpop.f32.mrb[21].mxu1  ;;  %v580_v54 = vrot.slane %v575_v57, %v579_v51  ;;  %v1175_v61 = vrot.slane %v1161_v50, %v579_v51  ;;  %v1179_v63 = vrot.slane %v1161_v50, %v583_v52 }
 0x297   : > { %v817_v15 = vadd.f32 %v816_v32, %v588_v60  ;;  %v4912_v14 = vrot.slane %v1161_v50, %v587_v56 }
 0x298   : > { %v4895_v33 = vadd.f32 %v1060_v49, %v822_v25  ;;  %v584_v49 = vrot.slane %v575_v57, %v583_v52 }
 0x299   : > { %v4897_v35 = vadd.f32 %v3126_v47, %v817_v15  ;;  %v3112_v39 = vpop.f32.mrb[22].mxu1  ;;  %v4906_v47 = vadd.f32 %v1175_v61, %v580_v54  ;;  %v1325_v24 = vadd.f32 %v1324_v5, %v4912_v14 }
 0x29a   : > { %v832_v22 = vadd.f32 %v3112_v39, %v588_v60  ;;  %v826_v40 = vpop.f32.mrb[23].mxu1  ;;  %v4908_v4 = vadd.f32 %v1179_v63, %v584_v49 }
 0x29b   : > { %v827_v41 = vadd.f32 %v826_v40, %v588_v60 }
 0x29c   : > { %v4899_v45 = vadd.f32 %v1050_v27, %v832_v22 }
 0x29d   : > { %v4901_v46 = vadd.f32 %v3123_v26, %v827_v41 }
 0x2c1   : > { %v1253_v0 = vpop.f32.mrb[0].mxu1 }
 0x2c2   : > { %v3985_v27 = vadd.f32 %v4906_v47, %v1253_v0  ;;  %v1255_v60 = vpop.f32.mrb[1].mxu1 }
 0x2c3   : > { %v3987_v8 = vadd.f32 %v4908_v4, %v1255_v60 }
 0x2c4   : > { %v2826_v26 = vmul.f32 -1.442695, %v3985_v27 }
 0x2c5   : > { %v2827_v7 = vmul.f32 -1.442695, %v3987_v8 }
 0x2c6   : > { %4107 = vpow2.f32 %v2826_v26 }
 0x2c7   : > { %4109 = vpow2.f32 %v2827_v7 }
 0x2d0   : > { %v4108_v13 = vpop.eup %4107 }
 0x2d1   : > { %v1332_v55 = vadd.f32 1.0, %v4108_v13  ;;  %v4110_v57 = vpop.eup %4109 }
 0x2d2   : > { %v1339_v20 = vadd.f32 1.0, %v4110_v57 }
 0x2d3   : > { %4111 = vrcp.f32 %v1332_v55 }
 0x2d4   : > { %4113 = vrcp.f32 %v1339_v20 }
 0x2dd   : > { %v4112_v25 = vpop.eup %4111 }
 0x2de   : > { %v1342_v32 = vmul.f32 %v4112_v25, %v1325_v24  ;;  %v4114_v39 = vpop.eup %4113 }
 0x2df   : > { %v1345_v22 = vsub.f32 1.0, %v4114_v39  ;;  %v1347_v51 = vmul.f32 0.0, %v4114_v39 }
 0x2e0   : > { %v1343_v15 = vadd.f32 %v1342_v32, %v1170_v12 }
 0x2e2   : > { %4115 = vtanh.f32 %v1343_v15 }
 0x2ec   : > { %v4116_v40 = vpop.eup %4115 }
 0x2ed   : > { %v1346_v41 = vmul.f32 %v4116_v40, %v1345_v22 }
 0x2ef   : > { %v4915_v52 = vadd.f32 %v1347_v51, %v1346_v41 }
 0x2f1   : > { %1424 = vmatmul.mubr.f32.vlgmr.msra.gmra.mrb[2].mxu1 %v4915_v52  ;;  %3201 = vmatmul.mubr.f32.vlgmr.msra.gmra.mrb[18].mxu0 %v4915_v52 }
 0x2f2   : > { %3627 = vmatpush1.bf16.msra.mxu1 %v4709_v58  ;;  %3658 = vmatpush3.bf16.msra.mxu0 %v4535_v11 }
 0x2f3   : > { %3629 = vmatprep.subr.bf16.mxu1 %v4711_v59  ;;  %3659 = vmatprep.subr.bf16.mxu0 %v4289_v2 }
 0x2f4   : > { %1595 = vmatprep.mubr.f32.mxu1 %v4288_v62  ;;  %3235 = vmatprep.mubr.msk.f32.mxu0 %vm4290_vm9, %v4288_v62 }
 0x2f6   : > { %3631 = vmatpush1.bf16.msra.mxu1 %v4731_v1  ;;  %3661 = vmatpush3.bf16.msra.mxu0 %v4555_v18 }
 0x2f7   : > { %3633 = vmatprep.subr.bf16.mxu1 %v4734_v3  ;;  %3662 = vmatprep.subr.bf16.mxu0 %v4289_v2 }
 0x2fa   : > { %3635 = vmatpush1.bf16.msra.mxu1 %v4754_v9  ;;  %3664 = vmatpush3.bf16.msra.mxu0 %v4576_v23 }
 0x2fb   : > { %3637 = vmatprep.subr.bf16.mxu1 %v4757_v10  ;;  %3665 = vmatprep.subr.bf16.mxu0 %v4289_v2 }
 0x2fe   : > { %3639 = vmatpush1.bf16.msra.mxu1 %v4777_v17  ;;  %3667 = vmatpush3.bf16.msra.mxu0 %v4597_v28 }
 0x2ff   : > { %3641 = vmatprep.subr.bf16.mxu1 %v4780_v19  ;;  %3668 = vmatprep.subr.bf16.mxu0 %v4289_v2 }
 0x302   : > { %3643 = vmatpush1.bf16.msra.mxu1 %v4800_v29  ;;  %3670 = vmatpush3.bf16.msra.mxu0 %v4616_v31 }
 0x303   : > { %3645 = vmatprep.subr.bf16.mxu1 %v4803_v30  ;;  %3671 = vmatprep.subr.bf16.mxu0 %v4289_v2 }
 0x306   : > { %3647 = vmatpush1.bf16.msra.mxu1 %v4823_v36  ;;  %3673 = vmatpush3.bf16.msra.mxu0 %v4629_v34 }
 0x307   : > { %3649 = vmatprep.subr.bf16.mxu1 %v4826_v38  ;;  %3674 = vmatprep.subr.bf16.mxu0 %v4289_v2 }
 0x30a   : > { %3651 = vmatpush1.bf16.msra.mxu1 %v4844_v42  ;;  %3676 = vmatpush3.bf16.msra.mxu0 %v4642_v37 }
 0x30b   : > { %3653 = vmatprep.subr.bf16.mxu1 %v4847_v43  ;;  %3677 = vmatprep.subr.bf16.mxu0 %v4289_v2 }
 0x30e   : > { %3655 = vmatpush1.bf16.msra.mxu1 %v4859_v21  ;;  %3679 = vmatpush3.bf16.msra.mxu0 %v4655_v44 }
 0x30f   : > { %3681 = vmatprep.subr.bf16.mxu1 %v4674_v53  ;;  %3712 = vmatprep.subr.bf16.mxu0 %v4289_v2 }
 0x3c4   : > { %v1425_v56 = vpop.f32.mrb[2].mxu1  ;;  %v1496_v5 = vpop.f32.mrb[18].mxu0 }
 0x3c5   : > { %v3989_v12 = vadd.f32 %v4906_v47, %v1425_v56  ;;  %v1427_v50 = vpop.f32.mrb[3].mxu1  ;;  %v3202_v54 = vpop.f32.mrb[19].mxu0  ;;  %v1497_v8 = vadd.f32 %v1496_v5, %v4912_v14 }
 0x3c6   : > { %v3991_v49 = vadd.f32 %v4908_v4, %v1427_v50 }
 0x3c7   : > { %v2828_v61 = vmul.f32 -1.442695, %v3989_v12 }
 0x3c8   : > { %v2829_v63 = vmul.f32 -1.442695, %v3991_v49 }
 0x3c9   : > { %4117 = vpow2.f32 %v2828_v61 }
 0x3ca   : > { %4119 = vpow2.f32 %v2829_v63 }
 0x3d3   : > { %v4118_v0 = vpop.eup %4117 }
 0x3d4   : > { %v1504_v27 = vadd.f32 1.0, %v4118_v0  ;;  %v4120_v60 = vpop.eup %4119 }
 0x3d5   : > { %v1511_v26 = vadd.f32 1.0, %v4120_v60 }
 0x3d6   : > { %4121 = vrcp.f32 %v1504_v27 }
 0x3d7   : > { %4123 = vrcp.f32 %v1511_v26 }
 0x3e0   : > { %v4122_v7 = vpop.eup %4121 }
 0x3e1   : > { %v1514_v13 = vmul.f32 %v4122_v7, %v1497_v8  ;;  %v4124_v57 = vpop.eup %4123 }
 0x3e2   : > { %v1517_v20 = vsub.f32 1.0, %v4124_v57  ;;  %v1519_v32 = vmul.f32 %v4124_v57, %v4915_v52 }
 0x3e3   : > { %v1515_v55 = vadd.f32 %v1514_v13, %v4889_v6 }
 0x3e5   : > { %4125 = vtanh.f32 %v1515_v55 }
 0x3ef   : > { %v4126_v24 = vpop.eup %4125 }
 0x3f0   : > { %v1518_v25 = vmul.f32 %v4126_v24, %v1517_v20 }
 0x3f2   : > { %v4959_v15 = vadd.f32 %v1519_v32, %v1518_v25 }
 0x3f4   : > { %1596 = vmatmul.mubr.f32.vlgmr.msra.gmra.mrb[4].mxu1 %v4959_v15  ;;  %3236 = vmatmul.mubr.f32.vlgmr.msra.gmra.mrb[20].mxu0 %v4959_v15 }
 0x3f5   : > { %3683 = vmatpush1.bf16.msra.mxu1 %v4709_v58  ;;  %3714 = vmatpush3.bf16.msra.mxu0 %v4535_v11 }
 0x3f6   : > { %3685 = vmatprep.subr.bf16.mxu1 %v4711_v59  ;;  %3715 = vmatprep.subr.bf16.mxu0 %v4289_v2 }
 0x3f7   : > { %1767 = vmatprep.mubr.f32.mxu1 %v4288_v62  ;;  %3270 = vmatprep.mubr.msk.f32.mxu0 %vm4290_vm9, %v4288_v62 }
 0x3f9   : > { %3687 = vmatpush1.bf16.msra.mxu1 %v4731_v1  ;;  %3717 = vmatpush3.bf16.msra.mxu0 %v4555_v18 }
 0x3fa   : > { %3689 = vmatprep.subr.bf16.mxu1 %v4734_v3  ;;  %3718 = vmatprep.subr.bf16.mxu0 %v4289_v2 }
 0x3fd   : > { %3691 = vmatpush1.bf16.msra.mxu1 %v4754_v9  ;;  %3720 = vmatpush3.bf16.msra.mxu0 %v4576_v23 }
 0x3fe   : > { %3693 = vmatprep.subr.bf16.mxu1 %v4757_v10  ;;  %3721 = vmatprep.subr.bf16.mxu0 %v4289_v2 }
 0x401   : > { %3695 = vmatpush1.bf16.msra.mxu1 %v4777_v17  ;;  %3723 = vmatpush3.bf16.msra.mxu0 %v4597_v28 }
 0x402   : > { %3697 = vmatprep.subr.bf16.mxu1 %v4780_v19  ;;  %3724 = vmatprep.subr.bf16.mxu0 %v4289_v2 }
 0x405   : > { %3699 = vmatpush1.bf16.msra.mxu1 %v4800_v29  ;;  %3726 = vmatpush3.bf16.msra.mxu0 %v4616_v31 }
 0x406   : > { %3701 = vmatprep.subr.bf16.mxu1 %v4803_v30  ;;  %3727 = vmatprep.subr.bf16.mxu0 %v4289_v2 }
 0x409   : > { %3703 = vmatpush1.bf16.msra.mxu1 %v4823_v36  ;;  %3729 = vmatpush3.bf16.msra.mxu0 %v4629_v34 }
 0x40a   : > { %3705 = vmatprep.subr.bf16.mxu1 %v4826_v38  ;;  %3730 = vmatprep.subr.bf16.mxu0 %v4289_v2 }
 0x40d   : > { %3707 = vmatpush1.bf16.msra.mxu1 %v4844_v42  ;;  %3732 = vmatpush3.bf16.msra.mxu0 %v4642_v37 }
 0x40e   : > { %3709 = vmatprep.subr.bf16.mxu1 %v4847_v43  ;;  %3733 = vmatprep.subr.bf16.mxu0 %v4289_v2 }
 0x411   : > { %3711 = vmatpush1.bf16.msra.mxu1 %v4859_v21  ;;  %3735 = vmatpush3.bf16.msra.mxu0 %v4655_v44 }
 0x412   : > { %3737 = vmatprep.subr.bf16.mxu1 %v4674_v53  ;;  %3768 = vmatprep.subr.bf16.mxu0 %v4289_v2 }
 0x4c7   : > { %v1597_v6 = vpop.f32.mrb[4].mxu1  ;;  %v1668_v39 = vpop.f32.mrb[20].mxu0 }
 0x4c8   : > { %v3993_v22 = vadd.f32 %v4906_v47, %v1597_v6  ;;  %v1599_v40 = vpop.f32.mrb[5].mxu1  ;;  %v3237_v41 = vpop.f32.mrb[21].mxu0  ;;  %v1669_v49 = vadd.f32 %v1668_v39, %v4912_v14 }
 0x4c9   : > { %v3995_v56 = vadd.f32 %v4908_v4, %v1599_v40 }
 0x4ca   : > { %v2830_v51 = vmul.f32 -1.442695, %v3993_v22 }
 0x4cb   : > { %v2831_v5 = vmul.f32 -1.442695, %v3995_v56 }
 0x4cc   : > { %4127 = vpow2.f32 %v2830_v51 }
 0x4cd   : > { %4129 = vpow2.f32 %v2831_v5 }
 0x4d6   : > { %v4128_v12 = vpop.eup %4127 }
 0x4d7   : > { %v1676_v50 = vadd.f32 1.0, %v4128_v12  ;;  %v4130_v54 = vpop.eup %4129 }
 0x4d8   : > { %v1683_v61 = vadd.f32 1.0, %v4130_v54 }
 0x4d9   : > { %4131 = vrcp.f32 %v1676_v50 }
 0x4da   : > { %4133 = vrcp.f32 %v1683_v61 }
 0x4e3   : > { %v4132_v63 = vpop.eup %4131 }
 0x4e4   : > { %v1686_v0 = vmul.f32 %v4132_v63, %v1669_v49  ;;  %v4134_v60 = vpop.eup %4133 }
 0x4e5   : > { %v1689_v26 = vsub.f32 1.0, %v4134_v60  ;;  %v1691_v13 = vmul.f32 %v4134_v60, %v4959_v15 }
 0x4e6   : > { %v1687_v27 = vadd.f32 %v1686_v0, %v4893_v16 }
 0x4e8   : > { %4135 = vtanh.f32 %v1687_v27 }
 0x4f2   : > { %v4136_v8 = vpop.eup %4135 }
 0x4f3   : > { %v1690_v7 = vmul.f32 %v4136_v8, %v1689_v26 }
 0x4f5   : > { %v5003_v55 = vadd.f32 %v1691_v13, %v1690_v7 }
 0x4f7   : > { %1768 = vmatmul.mubr.f32.vlgmr.msra.gmra.mrb[6].mxu1 %v5003_v55  ;;  %3271 = vmatmul.mubr.f32.vlgmr.msra.gmra.mrb[22].mxu0 %v5003_v55 }
 0x4f8   : > { %3739 = vmatpush1.bf16.msra.mxu1 %v4709_v58  ;;  %3770 = vmatpush3.bf16.msra.mxu0 %v4535_v11 }
 0x4f9   : > { %3741 = vmatprep.subr.bf16.mxu1 %v4711_v59  ;;  %3771 = vmatprep.subr.bf16.mxu0 %v4289_v2 }
 0x4fa   : > { %1939 = vmatprep.mubr.f32.mxu1 %v4288_v62  ;;  %3305 = vmatprep.mubr.msk.f32.mxu0 %vm4290_vm9, %v4288_v62 }
 0x4fc   : > { %3743 = vmatpush1.bf16.msra.mxu1 %v4731_v1  ;;  %3773 = vmatpush3.bf16.msra.mxu0 %v4555_v18 }
 0x4fd   : > { %3745 = vmatprep.subr.bf16.mxu1 %v4734_v3  ;;  %3774 = vmatprep.subr.bf16.mxu0 %v4289_v2 }
 0x500   : > { %3747 = vmatpush1.bf16.msra.mxu1 %v4754_v9  ;;  %3776 = vmatpush3.bf16.msra.mxu0 %v4576_v23 }
 0x501   : > { %3749 = vmatprep.subr.bf16.mxu1 %v4757_v10  ;;  %3777 = vmatprep.subr.bf16.mxu0 %v4289_v2 }
 0x504   : > { %3751 = vmatpush1.bf16.msra.mxu1 %v4777_v17  ;;  %3779 = vmatpush3.bf16.msra.mxu0 %v4597_v28 }
 0x505   : > { %3753 = vmatprep.subr.bf16.mxu1 %v4780_v19  ;;  %3780 = vmatprep.subr.bf16.mxu0 %v4289_v2 }
 0x508   : > { %3755 = vmatpush1.bf16.msra.mxu1 %v4800_v29  ;;  %3782 = vmatpush3.bf16.msra.mxu0 %v4616_v31 }
 0x509   : > { %3757 = vmatprep.subr.bf16.mxu1 %v4803_v30  ;;  %3783 = vmatprep.subr.bf16.mxu0 %v4289_v2 }
 0x50c   : > { %3759 = vmatpush1.bf16.msra.mxu1 %v4823_v36  ;;  %3785 = vmatpush3.bf16.msra.mxu0 %v4629_v34 }
 0x50d   : > { %3761 = vmatprep.subr.bf16.mxu1 %v4826_v38  ;;  %3786 = vmatprep.subr.bf16.mxu0 %v4289_v2 }
 0x510   : > { %3763 = vmatpush1.bf16.msra.mxu1 %v4844_v42  ;;  %3788 = vmatpush3.bf16.msra.mxu0 %v4642_v37 }
 0x511   : > { %3765 = vmatprep.subr.bf16.mxu1 %v4847_v43  ;;  %3789 = vmatprep.subr.bf16.mxu0 %v4289_v2 }
 0x514   : > { %3767 = vmatpush1.bf16.msra.mxu1 %v4859_v21  ;;  %3791 = vmatpush3.bf16.msra.mxu0 %v4655_v44 }
 0x515   : > { %3793 = vmatprep.subr.bf16.mxu1 %v4674_v53  ;;  %3824 = vmatprep.subr.bf16.mxu0 %v4289_v2 }
 0x5ca   : > { %v1769_v16 = vpop.f32.mrb[6].mxu1  ;;  %v1840_v57 = vpop.f32.mrb[22].mxu0 }
 0x5cb   : > { %v3997_v20 = vadd.f32 %v4906_v47, %v1769_v16  ;;  %v1771_v24 = vpop.f32.mrb[7].mxu1  ;;  %v3272_v25 = vpop.f32.mrb[23].mxu0  ;;  %v1841_v56 = vadd.f32 %v1840_v57, %v4912_v14 }
 0x5cc   : > { %v3999_v6 = vadd.f32 %v4908_v4, %v1771_v24 }
 0x5cd   : > { %v2832_v32 = vmul.f32 -1.442695, %v3997_v20 }
 0x5ce   : > { %v2833_v39 = vmul.f32 -1.442695, %v3999_v6 }
 0x5cf   : > { %4137 = vpow2.f32 %v2832_v32 }
 0x5d0   : > { %4139 = vpow2.f32 %v2833_v39 }
 0x5d9   : > { %v4138_v22 = vpop.eup %4137 }
 0x5da   : > { %v1848_v40 = vadd.f32 1.0, %v4138_v22  ;;  %v4140_v41 = vpop.eup %4139 }
 0x5db   : > { %v1855_v51 = vadd.f32 1.0, %v4140_v41 }
 0x5dc   : > { %4141 = vrcp.f32 %v1848_v40 }
 0x5dd   : > { %4143 = vrcp.f32 %v1855_v51 }
 0x5e6   : > { %v4142_v5 = vpop.eup %4141 }
 0x5e7   : > { %v1858_v12 = vmul.f32 %v4142_v5, %v1841_v56  ;;  %v4144_v54 = vpop.eup %4143 }
 0x5e8   : > { %v1861_v61 = vsub.f32 1.0, %v4144_v54  ;;  %v1863_v0 = vmul.f32 %v4144_v54, %v5003_v55 }
 0x5e9   : > { %v1859_v50 = vadd.f32 %v1858_v12, %v4891_v48 }
 0x5eb   : > { %4145 = vtanh.f32 %v1859_v50 }
 0x5f5   : > { %v4146_v49 = vpop.eup %4145 }
 0x5f6   : > { %v1862_v63 = vmul.f32 %v4146_v49, %v1861_v61 }
 0x5f8   : > { %v5047_v27 = vadd.f32 %v1863_v0, %v1862_v63 }
 0x5fa   : > { %1940 = vmatmul.mubr.f32.vlgmr.msra.gmra.mrb[8].mxu1 %v5047_v27  ;;  %3306 = vmatmul.mubr.f32.vlgmr.msra.gmra.mrb[24].mxu0 %v5047_v27 }
 0x5fb   : > { %3795 = vmatpush1.bf16.msra.mxu1 %v4709_v58  ;;  %3826 = vmatpush3.bf16.msra.mxu0 %v4535_v11 }
 0x5fc   : > { %3797 = vmatprep.subr.bf16.mxu1 %v4711_v59  ;;  %3827 = vmatprep.subr.bf16.mxu0 %v4289_v2 }
 0x5fd   : > { %2111 = vmatprep.mubr.f32.mxu1 %v4288_v62  ;;  %3340 = vmatprep.mubr.msk.f32.mxu0 %vm4290_vm9, %v4288_v62 }
 0x5ff   : > { %3799 = vmatpush1.bf16.msra.mxu1 %v4731_v1  ;;  %3829 = vmatpush3.bf16.msra.mxu0 %v4555_v18 }
 0x600   : > { %3801 = vmatprep.subr.bf16.mxu1 %v4734_v3  ;;  %3830 = vmatprep.subr.bf16.mxu0 %v4289_v2 }
 0x603   : > { %3803 = vmatpush1.bf16.msra.mxu1 %v4754_v9  ;;  %3832 = vmatpush3.bf16.msra.mxu0 %v4576_v23 }
 0x604   : > { %3805 = vmatprep.subr.bf16.mxu1 %v4757_v10  ;;  %3833 = vmatprep.subr.bf16.mxu0 %v4289_v2 }
 0x607   : > { %3807 = vmatpush1.bf16.msra.mxu1 %v4777_v17  ;;  %3835 = vmatpush3.bf16.msra.mxu0 %v4597_v28 }
 0x608   : > { %3809 = vmatprep.subr.bf16.mxu1 %v4780_v19  ;;  %3836 = vmatprep.subr.bf16.mxu0 %v4289_v2 }
 0x60b   : > { %3811 = vmatpush1.bf16.msra.mxu1 %v4800_v29  ;;  %3838 = vmatpush3.bf16.msra.mxu0 %v4616_v31 }
 0x60c   : > { %3813 = vmatprep.subr.bf16.mxu1 %v4803_v30  ;;  %3839 = vmatprep.subr.bf16.mxu0 %v4289_v2 }
 0x60f   : > { %3815 = vmatpush1.bf16.msra.mxu1 %v4823_v36  ;;  %3841 = vmatpush3.bf16.msra.mxu0 %v4629_v34 }
 0x610   : > { %3817 = vmatprep.subr.bf16.mxu1 %v4826_v38  ;;  %3842 = vmatprep.subr.bf16.mxu0 %v4289_v2 }
 0x613   : > { %3819 = vmatpush1.bf16.msra.mxu1 %v4844_v42  ;;  %3844 = vmatpush3.bf16.msra.mxu0 %v4642_v37 }
 0x614   : > { %3821 = vmatprep.subr.bf16.mxu1 %v4847_v43  ;;  %3845 = vmatprep.subr.bf16.mxu0 %v4289_v2 }
 0x617   : > { %3823 = vmatpush1.bf16.msra.mxu1 %v4859_v21  ;;  %3847 = vmatpush3.bf16.msra.mxu0 %v4655_v44 }
 0x618   : > { %3849 = vmatprep.subr.bf16.mxu1 %v4674_v53  ;;  %3880 = vmatprep.subr.bf16.mxu0 %v4289_v2 }
 0x6cd   : > { %v1941_v48 = vpop.f32.mrb[8].mxu1  ;;  %v2012_v60 = vpop.f32.mrb[24].mxu0 }
 0x6ce   : > { %v4001_v26 = vadd.f32 %v4906_v47, %v1941_v48  ;;  %v1943_v8 = vpop.f32.mrb[9].mxu1  ;;  %v3307_v7 = vpop.f32.mrb[25].mxu0  ;;  %v2013_v6 = vadd.f32 %v2012_v60, %v4912_v14 }
 0x6cf   : > { %v4003_v16 = vadd.f32 %v4908_v4, %v1943_v8 }
 0x6d0   : > { %v2834_v13 = vmul.f32 -1.442695, %v4001_v26 }
 0x6d1   : > { %v2835_v57 = vmul.f32 -1.442695, %v4003_v16 }
 0x6d2   : > { %4147 = vpow2.f32 %v2834_v13 }
 0x6d3   : > { %4149 = vpow2.f32 %v2835_v57 }
 0x6dc   : > { %v4148_v20 = vpop.eup %4147 }
 0x6dd   : > { %v2020_v24 = vadd.f32 1.0, %v4148_v20  ;;  %v4150_v25 = vpop.eup %4149 }
 0x6de   : > { %v2027_v32 = vadd.f32 1.0, %v4150_v25 }
 0x6df   : > { %4151 = vrcp.f32 %v2020_v24 }
 0x6e0   : > { %4153 = vrcp.f32 %v2027_v32 }
 0x6e9   : > { %v4152_v39 = vpop.eup %4151 }
 0x6ea   : > { %v2030_v22 = vmul.f32 %v4152_v39, %v2013_v6  ;;  %v4154_v41 = vpop.eup %4153 }
 0x6eb   : > { %v2033_v51 = vsub.f32 1.0, %v4154_v41  ;;  %v2035_v12 = vmul.f32 %v4154_v41, %v5047_v27 }
 0x6ec   : > { %v2031_v40 = vadd.f32 %v2030_v22, %v4897_v35 }
 0x6ee   : > { %4155 = vtanh.f32 %v2031_v40  ;;  %v2559_v40 = vld [vmem:[%s5306_s7 + $0x10] sm:$0xff] }
 0x6f8   : > { %v4156_v56 = vpop.eup %4155 }
 0x6f9   : > { %v2034_v5 = vmul.f32 %v4156_v56, %v2033_v51  ;;  %v2561_v51 = vld [vmem:[%s5306_s7 + $0x20] sm:$0xff]  ;;  %v2562_v56 = vld [vmem:[%s5306_s7 + $0x28] sm:$0xff] }
 0x6fb   : > { %v5091_v50 = vadd.f32 %v2035_v12, %v2034_v5  ;;  %v3967_v5 = vpack.c.bf16 %v2562_v56, %v2561_v51  ;;  %v2563_v12 = vld [vmem:[%s5306_s7 + $0x30] sm:$0xff] }
 0x6fd   : > { %2112 = vmatmul.mubr.f32.vlgmr.msra.gmra.mrb[10].mxu1 %v5091_v50  ;;  %3341 = vmatmul.mubr.f32.vlgmr.msra.gmra.mrb[26].mxu0 %v5091_v50 }
 0x6fe   : > { %3851 = vmatpush1.bf16.msra.mxu1 %v4709_v58  ;;  %3882 = vmatpush3.bf16.msra.mxu0 %v4535_v11 }
 0x6ff   : > { %3853 = vmatprep.subr.bf16.mxu1 %v4711_v59  ;;  %3883 = vmatprep.subr.bf16.mxu0 %v4289_v2 }
 0x700   : > { %2283 = vmatprep.mubr.f32.mxu1 %v4288_v62  ;;  %3375 = vmatprep.mubr.msk.f32.mxu0 %vm4290_vm9, %v4288_v62 }
 0x702   : > { %3855 = vmatpush1.bf16.msra.mxu1 %v4731_v1  ;;  %3885 = vmatpush3.bf16.msra.mxu0 %v4555_v18 }
 0x703   : > { %3857 = vmatprep.subr.bf16.mxu1 %v4734_v3  ;;  %3886 = vmatprep.subr.bf16.mxu0 %v4289_v2 }
 0x706   : > { %3859 = vmatpush1.bf16.msra.mxu1 %v4754_v9  ;;  %3888 = vmatpush3.bf16.msra.mxu0 %v4576_v23 }
 0x707   : > { %3861 = vmatprep.subr.bf16.mxu1 %v4757_v10  ;;  %3889 = vmatprep.subr.bf16.mxu0 %v4289_v2 }
 0x70a   : > { %3863 = vmatpush1.bf16.msra.mxu1 %v4777_v17  ;;  %3891 = vmatpush3.bf16.msra.mxu0 %v4597_v28 }
 0x70b   : > { %3865 = vmatprep.subr.bf16.mxu1 %v4780_v19  ;;  %3892 = vmatprep.subr.bf16.mxu0 %v4289_v2 }
 0x70e   : > { %3867 = vmatpush1.bf16.msra.mxu1 %v4800_v29  ;;  %3894 = vmatpush3.bf16.msra.mxu0 %v4616_v31 }
 0x70f   : > { %3869 = vmatprep.subr.bf16.mxu1 %v4803_v30  ;;  %3895 = vmatprep.subr.bf16.mxu0 %v4289_v2 }
 0x712   : > { %3871 = vmatpush1.bf16.msra.mxu1 %v4823_v36  ;;  %3897 = vmatpush3.bf16.msra.mxu0 %v4629_v34 }
 0x713   : > { %3873 = vmatprep.subr.bf16.mxu1 %v4826_v38  ;;  %3898 = vmatprep.subr.bf16.mxu0 %v4289_v2 }
 0x716   : > { %3875 = vmatpush1.bf16.msra.mxu1 %v4844_v42  ;;  %3900 = vmatpush3.bf16.msra.mxu0 %v4642_v37 }
 0x717   : > { %3877 = vmatprep.subr.bf16.mxu1 %v4847_v43  ;;  %3901 = vmatprep.subr.bf16.mxu0 %v4289_v2 }
 0x71a   : > { %3879 = vmatpush1.bf16.msra.mxu1 %v4859_v21  ;;  %3903 = vmatpush3.bf16.msra.mxu0 %v4655_v44 }
 0x71b   : > { %3905 = vmatprep.subr.bf16.mxu1 %v4674_v53  ;;  %3936 = vmatprep.subr.bf16.mxu0 %v4289_v2 }
 0x7d0   : > { %v2113_v35 = vpop.f32.mrb[10].mxu1  ;;  %v2184_v54 = vpop.f32.mrb[26].mxu0 }
 0x7d1   : > { %v4005_v61 = vadd.f32 %v4906_v47, %v2113_v35  ;;  %v2115_v49 = vpop.f32.mrb[11].mxu1  ;;  %v3342_v63 = vpop.f32.mrb[27].mxu0  ;;  %v2185_v53 = vadd.f32 %v2184_v54, %v4912_v14  ;;  %v2564_v35 = vld [vmem:[%s5306_s7 + $0x38] sm:$0xff] }
 0x7d2   : > { %v4007_v48 = vadd.f32 %v4908_v4, %v2115_v49  ;;  %v3970_v54 = vpack.c.bf16 %v2564_v35, %v2563_v12  ;;  %v2566_v49 = vld [vmem:[%s5306_s7 + $0x48] sm:$0xff] }
 0x7d3   : > { %v2836_v0 = vmul.f32 -1.442695, %v4005_v61  ;;  %v2565_v61 = vld [vmem:[%s5306_s7 + $0x40] sm:$0xff] }
 0x7d4   : > { %v2837_v60 = vmul.f32 -1.442695, %v4007_v48  ;;  %v3973_v63 = vpack.c.bf16 %v2566_v49, %v2565_v61  ;;  %v2568_v48 = vld [vmem:[%s5306_s7 + $0x58] sm:$0xff] }
 0x7d5   : > { %4157 = vpow2.f32 %v2836_v0  ;;  %v2567_v0 = vld [vmem:[%s5306_s7 + $0x50] sm:$0xff] }
 0x7d6   : > { %4159 = vpow2.f32 %v2837_v60  ;;  %v3976_v60 = vpack.c.bf16 %v2568_v48, %v2567_v0 }
 0x7df   : > { %v4158_v26 = vpop.eup %4157 }
 0x7e0   : > { %v2192_v8 = vadd.f32 1.0, %v4158_v26  ;;  %v4160_v7 = vpop.eup %4159  ;;  %v2569_v26 = vld [vmem:[%s5306_s7 + $0x60] sm:$0xff] }
 0x7e1   : > { %v2199_v13 = vadd.f32 1.0, %v4160_v7 }
 0x7e2   : > { %4161 = vrcp.f32 %v2192_v8  ;;  %v2570_v8 = vld [vmem:[%s5306_s7 + $0x68] sm:$0xff] }
 0x7e3   : > { %4163 = vrcp.f32 %v2199_v13  ;;  %v3979_v7 = vpack.c.bf16 %v2570_v8, %v2569_v26  ;;  %v2571_v13 = vld [vmem:[%s5306_s7 + $0x70] sm:$0xff] }
 0x7ec   : > { %v4162_v16 = vpop.eup %4161 }
 0x7ed   : > { %v2202_v57 = vmul.f32 %v4162_v16, %v2185_v53  ;;  %v4164_v24 = vpop.eup %4163  ;;  %v2572_v53 = vld [vmem:[%s5306_s7 + $0x78] sm:$0xff] }
 0x7ee   : > { %v2205_v25 = vsub.f32 1.0, %v4164_v24  ;;  %v2207_v39 = vmul.f32 %v4164_v24, %v5091_v50  ;;  %v3982_v16 = vpack.c.bf16 %v2572_v53, %v2571_v13 }
 0x7ef   : > { %v2203_v20 = vadd.f32 %v2202_v57, %v4895_v33  ;;  %v2558_v33 = vld [vmem:[%s5306_s7 + $0x8] sm:$0xff] }
 0x7f1   : > { %4165 = vtanh.f32 %v2203_v20 }
 0x7fb   : > { %v4166_v32 = vpop.eup %4165 }
 0x7fc   : > { %v2206_v6 = vmul.f32 %v4166_v32, %v2205_v25 }
 0x7fe   : > { %v5135_v22 = vadd.f32 %v2207_v39, %v2206_v6 }
 0x800   : > { %2284 = vmatmul.mubr.f32.vlgmr.msra.gmra.mrb[12].mxu1 %v5135_v22  ;;  %3376 = vmatmul.mubr.f32.vlgmr.msra.gmra.mrb[28].mxu0 %v5135_v22 }
 0x801   : > { %3907 = vmatpush1.bf16.msra.mxu1 %v4709_v58  ;;  %3938 = vmatpush3.bf16.msra.mxu0 %v4535_v11 }
 0x802   : > { %3909 = vmatprep.subr.bf16.mxu1 %v4711_v59  ;;  %3939 = vmatprep.subr.bf16.mxu0 %v4289_v2 }
 0x803   : > { %2455 = vmatprep.mubr.f32.mxu1 %v4288_v62  ;;  %3410 = vmatprep.mubr.msk.f32.mxu0 %vm4290_vm9, %v4288_v62 }
 0x805   : > { %3911 = vmatpush1.bf16.msra.mxu1 %v4731_v1  ;;  %3941 = vmatpush3.bf16.msra.mxu0 %v4555_v18 }
 0x806   : > { %3913 = vmatprep.subr.bf16.mxu1 %v4734_v3  ;;  %3942 = vmatprep.subr.bf16.mxu0 %v4289_v2 }
 0x809   : > { %3915 = vmatpush1.bf16.msra.mxu1 %v4754_v9  ;;  %3944 = vmatpush3.bf16.msra.mxu0 %v4576_v23 }
 0x80a   : > { %3917 = vmatprep.subr.bf16.mxu1 %v4757_v10  ;;  %3945 = vmatprep.subr.bf16.mxu0 %v4289_v2 }
 0x80d   : > { %3919 = vmatpush1.bf16.msra.mxu1 %v4777_v17  ;;  %3947 = vmatpush3.bf16.msra.mxu0 %v4597_v28 }
 0x80e   : > { %3921 = vmatprep.subr.bf16.mxu1 %v4780_v19  ;;  %3948 = vmatprep.subr.bf16.mxu0 %v4289_v2 }
 0x811   : > { %3923 = vmatpush1.bf16.msra.mxu1 %v4800_v29  ;;  %3950 = vmatpush3.bf16.msra.mxu0 %v4616_v31 }
 0x812   : > { %3925 = vmatprep.subr.bf16.mxu1 %v4803_v30  ;;  %3951 = vmatprep.subr.bf16.mxu0 %v4289_v2 }
 0x815   : > { %3927 = vmatpush1.bf16.msra.mxu1 %v4823_v36  ;;  %3953 = vmatpush3.bf16.msra.mxu0 %v4629_v34 }
 0x816   : > { %3929 = vmatprep.subr.bf16.mxu1 %v4826_v38  ;;  %3954 = vmatprep.subr.bf16.mxu0 %v4289_v2 }
 0x819   : > { %3931 = vmatpush1.bf16.msra.mxu1 %v4844_v42  ;;  %3956 = vmatpush3.bf16.msra.mxu0 %v4642_v37 }
 0x81a   : > { %3933 = vmatprep.subr.bf16.mxu1 %v4847_v43  ;;  %3957 = vmatprep.subr.bf16.mxu0 %v4289_v2 }
 0x81d   : > { %3935 = vmatpush1.bf16.msra.mxu1 %v4859_v21  ;;  %3959 = vmatpush3.bf16.msra.mxu0 %v4655_v44  ;;  %v2557_v21 = vld [vmem:[%s5306_s7] sm:$0xff] }
 0x81e   : > { %3960 = vmatprep.subr.bf16.mxu0 %v4289_v2 }
 0x8d3   : > { %v2285_v11 = vpop.f32.mrb[12].mxu1  ;;  %v2356_v18 = vpop.f32.mrb[28].mxu0 }
 0x8d4   : > { %v4009_v23 = vadd.f32 %v4906_v47, %v2285_v11  ;;  %v2287_v28 = vpop.f32.mrb[13].mxu1  ;;  %v3377_v31 = vpop.f32.mrb[29].mxu0  ;;  %v2357_v44 = vadd.f32 %v2356_v18, %v4912_v14 }
 0x8d5   : > { %v4011_v58 = vadd.f32 %v4908_v4, %v2287_v28 }
 0x8d6   : > { %v2838_v34 = vmul.f32 -1.442695, %v4009_v23 }
 0x8d7   : > { %v2839_v37 = vmul.f32 -1.442695, %v4011_v58 }
 0x8d8   : > { %4167 = vpow2.f32 %v2838_v34 }
 0x8d9   : > { %4169 = vpow2.f32 %v2839_v37 }
 0x8e2   : > { %v4168_v59 = vpop.eup %4167 }
 0x8e3   : > { %v2364_v1 = vadd.f32 1.0, %v4168_v59  ;;  %v4170_v3 = vpop.eup %4169 }
 0x8e4   : > { %v2371_v9 = vadd.f32 1.0, %v4170_v3 }
 0x8e5   : > { %4171 = vrcp.f32 %v2364_v1 }
 0x8e6   : > { %4173 = vrcp.f32 %v2371_v9 }
 0x8ef   : > { %v4172_v10 = vpop.eup %4171 }
 0x8f0   : > { %v2374_v17 = vmul.f32 %v4172_v10, %v2357_v44  ;;  %v4174_v29 = vpop.eup %4173 }
 0x8f1   : > { %v2377_v30 = vsub.f32 1.0, %v4174_v29  ;;  %v2379_v42 = vmul.f32 %v4174_v29, %v5135_v22 }
 0x8f2   : > { %v2375_v19 = vadd.f32 %v2374_v17, %v4901_v46  ;;  %v3961_v46 = vpack.c.bf16 %v2558_v33, %v2557_v21 }
 0x8f4   : > { %4175 = vtanh.f32 %v2375_v19 }
 0x8fe   : > { %v4176_v36 = vpop.eup %4175 }
 0x8ff   : > { %v2378_v38 = vmul.f32 %v4176_v36, %v2377_v30 }
 0x901   : > { %v5178_v43 = vadd.f32 %v2379_v42, %v2378_v38 }
 0x903   : > { %2456 = vmatmul.mubr.f32.vlgmr.msra.gmra.mrb[14].mxu1 %v5178_v43  ;;  %3411 = vmatmul.mubr.f32.vlgmr.msra.gmra.mrb[30].mxu0 %v5178_v43 }
 0x904   : > { %3445 = vmatprep.mubr.msk.f32.mxu0 %vm4290_vm9, %v4288_v62  ;;  %3962 = vmatpush3.bf16.msra.mxu0 %v3961_v46  ;;  %v2560_v62 = vld [vmem:[%s5306_s7 + $0x18] sm:$0xff] }
 0x905   : > { %3963 = vmatprep.subr.bf16.mxu0 %v4289_v2  ;;  %v3964_v41 = vpack.c.bf16 %v2560_v62, %v2559_v40 }
 0x908   : > { %3965 = vmatpush3.bf16.msra.mxu0 %v3964_v41 }
 0x909   : > { %3966 = vmatprep.subr.bf16.mxu0 %v4289_v2 }
 0x90c   : > { %3968 = vmatpush3.bf16.msra.mxu0 %v3967_v5 }
 0x90d   : > { %3969 = vmatprep.subr.bf16.mxu0 %v4289_v2 }
 0x910   : > { %3971 = vmatpush3.bf16.msra.mxu0 %v3970_v54 }
 0x911   : > { %3972 = vmatprep.subr.bf16.mxu0 %v4289_v2 }
 0x914   : > { %3974 = vmatpush3.bf16.msra.mxu0 %v3973_v63 }
 0x915   : > { %3975 = vmatprep.subr.bf16.mxu0 %v4289_v2 }
 0x918   : > { %3977 = vmatpush3.bf16.msra.mxu0 %v3976_v60 }
 0x919   : > { %3978 = vmatprep.subr.bf16.mxu0 %v4289_v2 }
 0x91c   : > { %3980 = vmatpush3.bf16.msra.mxu0 %v3979_v7 }
 0x91d   : > { %3981 = vmatprep.subr.bf16.mxu0 %v4289_v2 }
 0x920   : > { %3983 = vmatpush3.bf16.msra.mxu0 %v3982_v16 }
 0x9d6   : > { %v2457_v57 = vpop.f32.mrb[14].mxu1  ;;  %v2528_v20 = vpop.f32.mrb[30].mxu0 }
 0x9d7   : > { %v4013_v24 = vadd.f32 %v4906_v47, %v2457_v57  ;;  %v2459_v25 = vpop.f32.mrb[15].mxu1  ;;  %v3412_v32 = vpop.f32.mrb[31].mxu0  ;;  %v2529_v2 = vadd.f32 %v2528_v20, %v4912_v14 }
 0x9d8   : > { %v4015_v39 = vadd.f32 %v4908_v4, %v2459_v25  ;;  %v1521_v4 = vadd.f32 %v4959_v15, %v4915_v52 }
 0x9d9   : > { %v2840_v6 = vmul.f32 -1.442695, %v4013_v24 }
 0x9da   : > { %v2841_v11 = vmul.f32 -1.442695, %v4015_v39  ;;  %v1693_v37 = vadd.f32 %v5003_v55, %v1521_v4 }
 0x9db   : > { %4177 = vpow2.f32 %v2840_v6 }
 0x9dc   : > { %4179 = vpow2.f32 %v2841_v11  ;;  %v1865_v1 = vadd.f32 %v5047_v27, %v1693_v37 }
 0x9de   : > { %v2037_v3 = vadd.f32 %v5091_v50, %v1865_v1 }
 0x9e0   : > { %v2209_v14 = vadd.f32 %v5135_v22, %v2037_v3 }
 0x9e2   : > { %v2381_v17 = vadd.f32 %v5178_v43, %v2209_v14 }
 0x9e5   : > { %v4178_v18 = vpop.eup %4177 }
 0x9e6   : > { %v2536_v23 = vadd.f32 1.0, %v4178_v18  ;;  %v4180_v28 = vpop.eup %4179 }
 0x9e7   : > { %v2543_v31 = vadd.f32 1.0, %v4180_v28 }
 0x9e8   : > { %4181 = vrcp.f32 %v2536_v23 }
 0x9e9   : > { %4183 = vrcp.f32 %v2543_v31 }
 0x9f2   : > { %v4182_v34 = vpop.eup %4181 }
 0x9f3   : > { %v2546_v58 = vmul.f32 %v4182_v34, %v2529_v2  ;;  %v4184_v59 = vpop.eup %4183 }
 0x9f4   : > { %v2549_v9 = vsub.f32 1.0, %v4184_v59 }
 0x9f5   : > { %v2547_v47 = vadd.f32 %v2546_v58, %v4899_v45  ;;  %v2551_v45 = vmul.f32 %v4184_v59, %v5178_v43 }
 0x9f7   : > { %4185 = vtanh.f32 %v2547_v47 }
 0xa01   : > { %v4186_v44 = vpop.eup %4185 }
 0xa02   : > { %v2550_v10 = vmul.f32 %v4186_v44, %v2549_v9 }
 0xa04   : > { %v2552_v52 = vadd.f32 %v2551_v45, %v2550_v10 }
 0xa06   : > { %v2553_v15 = vadd.f32 %v2552_v52, %v2381_v17 }
 0xa08   : > { %v2554_v55 = vmul.f32 0.125, %v2553_v15 }
 0xa0a   : > { %3446 = vmatmul.mubr.f32.vlgmr.msra.gmra.mrb[32].mxu0 %v2554_v55  ;;  %2556 = vst.msk [vmem:[%s374_s12] sm:$0xff] %vm2555_vm10, %v2554_v55 }
 0xa0b   : > { %4228 = shalt.err (!%p4225_p7)
}
 0xa0c   : > { %s4229_s17 = scalar_lea.hbm %s5256_s20, 128  ;;  %s4233_s12 = scalar_lea.hbm %s5309_s10, 256 }
 0xa0d   : > { %p4230_p8 = scmp.ne.s32.totalorder %s5256_s20, %s4229_s17  ;;  %p4234_p1 = scmp.lt.u32.totalorder %s5256_s20, %s5309_s10 }
 0xa0e   : > { %p4235_p0 = scmp.lt.u32.totalorder %s4233_s12, %s4229_s17  ;;  %p4237_p6 = scmp.lt.u32.totalorder %s4229_s17, %s5256_s20 }
 0xa0f   : > { %p4231_p11 = pnand %p4230_p8, %p5326_p9 }
 0xa10   : > { %p4236_p5 = por %p4235_p0, %p4234_p1 }
 0xa11   : > { %p4232_p13 = pneg %p4231_p11 }
 0xa12   : > { %p4238_p10 = por %p4237_p6, %p4236_p5 }
 0xa14   : > { %p4239_p12 = pnand %p4238_p10, %p4232_p13 }
 0xa16   : > { %4242 = shalt.err (!%p4239_p12)
}
 0xa17   : > { %4052 = dma.vmem_to_hbm [thread:$0]  (%p5326_p9), %s2674_s0, 128, %s5256_s20, %s2657_s21   ;;  %v2842_v27 = vld [vmem:[%s5307_s8] ss:$0 sm:$0xff]  ;;  %vm2650_vm11 = vcmask 31744  }
 0xa18   : > { %s2777_s2 = sshll.u32 %s4432_s28, 3 }
 0xa19   : > { %s383_s29 = scalar_lea.vmem %s5308_s9, %s2777_s2 }
 0xadd   : > { %v2646_v50 = vpop.f32.mrb[32].mxu0 }
 0xade   : > { %v2647_v22 = vadd.f32 %v2842_v27, %v2646_v50  ;;  %v3447_v19 = vpop.f32.mrb[33].mxu0 }
 0xae0   : > { %2651 = vst.msk [vmem:[%s383_s29] sm:$0xff] %vm2650_vm11, %v2647_v22 }
 0xae1 PF: > { %p4064_p2 = scmp.ge.s32.totalorder %s4281_s16, 2  ;;  %s2692_s23 = sand.u32 1, %s4269_s13  }
 0xae2   : > { %p5327_p9 = scmp.ne.s32.totalorder %s5317_s24, 0  ;;  %s2693_s28 = scalar_lea.sflag [#allocation6], %s2692_s23 }
 0xae4   : > { %p4059_p3 = pnand %p4064_p2, %p5327_p9 }
 0xae6   : > { %4264 = dma.done.wait (!%p4059_p3), %s2693_s28, 128  }
 0xae7   : > { %4266 = vsyncadd (!%p4059_p3), %s2693_s28, 4294967168  ;;  %p22_p4 = scmp.ge.s32.totalorder %s4372_s19, 4   ;;  %s5328_s13 = smov %s4273_s14 }
 0xae8   : > { %s5329_s14 = smov %s4277_s15  ;;  %s5330_s15 = smov %s4383_s22 }
 0xae9   : > { %s5331_s16 = smov %s4372_s19  ;;  %24 = sbr.rel (!%p22_p4) target bundleno = 8 (0x8), region = 108 }
 0xaf0   :  { %2698 = vsyncpa [#allocation5], 1 }
 0xaf1   :  { %2700 = vsyncpa [#allocation5 + $0x1], 1 }
 0xaf2   :  { %2701 = vsyncpa [#allocation6], 1 }
 0xaf3   :  { %2703 = vsyncpa [#allocation6 + $0x1], 1 }

</bundles_post_ra>
